<compile_context>
chip_gen: v7x
topology: tpu7x:2x2x1
jax: 0.10.0
libtpu: 0.0.40
codegen_flags: <defaults>
</compile_context>

<pallas_src>
import functools
import math

import numpy as np

import jax
import jax.numpy as jnp
from jax.experimental import pallas as pl
from jax.experimental.pallas import tpu as pltpu


# ----------------------------------------------------------------------------
# Host-side constants
# ----------------------------------------------------------------------------

def _seasonal_matrix(seq_len: int, kernel_size: int) -> np.ndarray:
    """(I - A) where A is the replicate-padded moving-average operator.

    trend = A @ x (along the sequence axis); seasonal = x - trend = (I - A) @ x.
    Matches the canonical Autoformer series_decomp: AvgPool1d(kernel, stride=1)
    over the series padded with (kernel-1)//2 edge replicas on each side.
    """
    pad = (kernel_size - 1) // 2
    avg = np.zeros((seq_len, seq_len), np.float32)
    for t in range(seq_len):
        for j in range(kernel_size):
            s = min(max(t + j - pad, 0), seq_len - 1)
            avg[t, s] += 1.0 / float(kernel_size)
    return np.eye(seq_len, dtype=np.float32) - avg


def _dft_matrices(seq_len: int):
    """Real/imag DFT matrices: Fc[f,t]=cos(2*pi*f*t/L), Fs[f,t]=sin(2*pi*f*t/L).

    Both symmetric.  Used to express the FFT-based circular correlation and the
    circulant delay aggregation of AutoCorrelation as plain MXU matmuls.
    """
    t = np.arange(seq_len, dtype=np.float64)
    ang = 2.0 * np.pi * np.outer(t, t) / float(seq_len)
    return np.cos(ang).astype(np.float32), np.sin(ang).astype(np.float32)


# ----------------------------------------------------------------------------
# Fused Encoder kernel: all blocks, one grid step per batch element.
# ----------------------------------------------------------------------------

def _encoder_kernel(x_ref, wqkv_ref, bqkv_ref, wo_ref, bo_ref,
                    w1_ref, b1_ref, w2_ref, b2_ref, g_ref, beta_ref,
                    sdec_ref, fc_ref, fs_ref, o_ref, *, n_blocks, top_k, eps):
    L, E = x_ref.shape[1], x_ref.shape[2]
    inv_le = 1.0 / float(L * E)        # irfft 1/L  *  channel mean 1/E
    inv_l = 1.0 / float(L)             # irfft 1/L for the aggregation

    x = x_ref[0]                       # (L, E) activation, stays resident
    sdec = sdec_ref[...]               # (L, L): seasonal = sdec @ y
    fc = fc_ref[...]                   # (L, L) cos-DFT
    fs = fs_ref[...]                   # (L, L) sin-DFT

    ii = jax.lax.broadcasted_iota(jnp.int32, (L, L), 0)   # competitor index
    jj = jax.lax.broadcasted_iota(jnp.int32, (L, L), 1)   # candidate index
    eyef = (ii == jj).astype(jnp.float32)

    for blk in range(n_blocks):
        # ---- fused Q|K|V projection: one wide MXU matmul ---------------------
        qkv = jnp.dot(x, wqkv_ref[blk],
                      preferred_element_type=jnp.float32) + bqkv_ref[blk]   # (L, 3E)

        # ---- forward DFT (along time) of Q, K, V in one shot (MXU) -----------
        qkv_c = jnp.dot(fc, qkv, preferred_element_type=jnp.float32)        # Re part basis
        qkv_s = jnp.dot(fs, qkv, preferred_element_type=jnp.float32)        # Im part basis
        qc, kc, vc = qkv_c[:, :E], qkv_c[:, E:2 * E], qkv_c[:, 2 * E:3 * E]
        qs, ks, vs = qkv_s[:, :E], qkv_s[:, E:2 * E], qkv_s[:, 2 * E:3 * E]

        # ---- channel-mean circular correlation via correlation theorem -------
        # R_hat = Q_hat * conj(K_hat) summed over channels;
        # mv[tau] = (1/(L*E)) * IDFT(R_hat)[tau]
        #         = (1/E) * irfft(rfft(Q)*conj(rfft(K))).sum(channels)  (exact)
        re_r = jnp.sum(qc * kc + qs * ks, axis=-1, keepdims=True) * inv_le  # (L, 1)
        im_r = jnp.sum(qc * ks - qs * kc, axis=-1, keepdims=True) * inv_le  # (L, 1)
        mv_row = jnp.sum(fc * re_r - fs * im_r, axis=0, keepdims=True)      # (1, L)
        mv_col = jnp.sum(eyef * mv_row, axis=-1, keepdims=True)             # (L, 1)

        # ---- top-k delay selection + softmax over the selected correlations --
        # rank[tau] = #delays with strictly larger correlation (ties -> lower
        # index wins), so (rank < top_k) reproduces lax.top_k / torch.topk.
        beats = (mv_col > mv_row) | ((mv_col == mv_row) & (ii < jj))
        rank = jnp.sum(beats.astype(jnp.float32), axis=0, keepdims=True)
        sel = rank < float(top_k)
        mmax = jnp.max(jnp.where(sel, mv_row, -jnp.inf), axis=-1, keepdims=True)
        ew = jnp.where(sel, jnp.exp(mv_row - mmax), 0.0)
        w = ew * pl.reciprocal(jnp.sum(ew, axis=-1, keepdims=True),
                               approx=True)                                 # (1, L)

        # ---- time-delay aggregation: agg[t] = sum_tau w[tau] * V[(t+tau)%L] --
        # Applied as a circulant in the frequency domain:
        #   agg = (1/L) * IDFT( V_hat * conj(w_hat) )   -> two MXU matmuls.
        wsc = w * inv_l
        wc = jnp.sum(fc * wsc, axis=-1, keepdims=True)                      # (L, 1)
        wsn = jnp.sum(fs * wsc, axis=-1, keepdims=True)                     # (L, 1)
        re_a = vc * wc + vs * wsn
        im_a = vc * wsn - vs * wc
        agg = (jnp.dot(fc, re_a, preferred_element_type=jnp.float32)
               - jnp.dot(fs, im_a, preferred_element_type=jnp.float32))     # (L, E)

        attn = jnp.dot(agg, wo_ref[blk],
                       preferred_element_type=jnp.float32) + bo_ref[blk]

        # ---- residual + series decomposition (keep seasonal part only) -------
        x = jnp.dot(sdec, x + attn, preferred_element_type=jnp.float32)

        # ---- feed forward (exact erf GELU, as torch nn.GELU default) ---------
        h = jnp.dot(x, w1_ref[blk],
                    preferred_element_type=jnp.float32) + b1_ref[blk]
        h = 0.5 * h * (1.0 + jax.lax.erf(h * 0.7071067811865476))
        ff = jnp.dot(h, w2_ref[blk],
                     preferred_element_type=jnp.float32) + b2_ref[blk]
        x = jnp.dot(sdec, x + ff, preferred_element_type=jnp.float32)

        # ---- special LayerNorm: LN over embed dim, minus per-sequence mean ---
        mu = jnp.mean(x, axis=-1, keepdims=True)
        var = jnp.mean((x - mu) ** 2, axis=-1, keepdims=True)
        xh = (x - mu) * jax.lax.rsqrt(var + eps) * g_ref[blk] + beta_ref[blk]
        x = xh - jnp.mean(xh, axis=0, keepdims=True)

    o_ref[0] = x


# ----------------------------------------------------------------------------
# Wrapper
# ----------------------------------------------------------------------------

def encoder_forward(x, params, *, kernel_size, corr_factor, n_heads=None):
    """Autoformer Encoder forward.  `n_heads` is accepted for API fidelity but
    cancels analytically under the inference-style delay aggregation."""
    del n_heads
    B, L, E = x.shape
    n_blocks = params["wo"].shape[0]
    hidden = params["w1"].shape[2]
    top_k = max(1, min(L, int(corr_factor * math.log(L))))
    sdec = jnp.asarray(_seasonal_matrix(L, kernel_size))
    fc_np, fs_np = _dft_matrices(L)
    fc = jnp.asarray(fc_np)
    fs = jnp.asarray(fs_np)

    kernel = functools.partial(_encoder_kernel, n_blocks=n_blocks,
                               top_k=top_k, eps=1e-5)

    x_map = lambda b: (b, 0, 0)
    w3_map = lambda b: (0, 0, 0)
    w2_map = lambda b: (0, 0)

    grid_spec = pltpu.PrefetchScalarGridSpec(
        num_scalar_prefetch=0,
        grid=(B,),
        in_specs=[
            pl.BlockSpec((1, L, E), x_map),                    # x (per batch)
            pl.BlockSpec((n_blocks, E, 3 * E), w3_map),        # Wq|Wk|Wv fused
            pl.BlockSpec((n_blocks, 1, 3 * E), w3_map),        # bq|bk|bv fused
            pl.BlockSpec((n_blocks, E, E), w3_map),            # Wo
            pl.BlockSpec((n_blocks, 1, E), w3_map),            # bo
            pl.BlockSpec((n_blocks, E, hidden), w3_map),       # W1
            pl.BlockSpec((n_blocks, 1, hidden), w3_map),       # b1
            pl.BlockSpec((n_blocks, hidden, E), w3_map),       # W2
            pl.BlockSpec((n_blocks, 1, E), w3_map),            # b2
            pl.BlockSpec((n_blocks, 1, E), w3_map),            # LN gamma
            pl.BlockSpec((n_blocks, 1, E), w3_map),            # LN beta
            pl.BlockSpec((L, L), w2_map),                      # seasonal matrix
            pl.BlockSpec((L, L), w2_map),                      # cos-DFT matrix
            pl.BlockSpec((L, L), w2_map),                      # sin-DFT matrix
        ],
        out_specs=pl.BlockSpec((1, L, E), x_map),
    )

    return pl.pallas_call(
        kernel,
        out_shape=jax.ShapeDtypeStruct((B, L, E), jnp.float32),
        grid_spec=grid_spec,
        compiler_params=pltpu.CompilerParams(
            dimension_semantics=("parallel",)),
    )(x, params["wqkv"], params["bqkv"], params["wo"], params["bo"],
      params["w1"], params["b1"], params["w2"], params["b2"],
      params["ln_g"], params["ln_b"], sdec, fc, fs)


# ----------------------------------------------------------------------------
# Deterministic parameter init (stored pre-transposed / pre-stacked / fused)
# ----------------------------------------------------------------------------

def init_encoder_params(key, *, embed_dim, expanse_dim, n_blocks):
    def linear_init(k, d_in, d_out):
        kw, kb = jax.random.split(k)
        w = jax.random.normal(kw, (d_in, d_out), jnp.float32) * 0.05
        b = jax.random.normal(kb, (1, d_out), jnp.float32) * 0.01
        return w, b

    wqkv, bqkv, wo, bo, w1, b1, w2, b2, ln_g, ln_b = ([] for _ in range(10))
    for block_key in jax.random.split(key, n_blocks):
        ks = jax.random.split(block_key, 6)
        wq, bq = linear_init(ks[0], embed_dim, embed_dim)
        wk, bk = linear_init(ks[1], embed_dim, embed_dim)
        wv, bv = linear_init(ks[2], embed_dim, embed_dim)
        wqkv.append(jnp.concatenate([wq, wk, wv], axis=1))     # (E, 3E)
        bqkv.append(jnp.concatenate([bq, bk, bv], axis=1))     # (1, 3E)
        wo_i, bo_i = linear_init(ks[3], embed_dim, embed_dim)
        w1_i, b1_i = linear_init(ks[4], embed_dim, expanse_dim)
        w2_i, b2_i = linear_init(ks[5], expanse_dim, embed_dim)
        wo.append(wo_i); bo.append(bo_i)
        w1.append(w1_i); b1.append(b1_i)
        w2.append(w2_i); b2.append(b2_i)
        ln_g.append(jnp.ones((1, embed_dim), jnp.float32))
        ln_b.append(jnp.zeros((1, embed_dim), jnp.float32))

    stack = lambda t: jnp.stack(t, axis=0)
    return {
        "wqkv": stack(wqkv), "bqkv": stack(bqkv),
        "wo": stack(wo), "bo": stack(bo),
        "w1": stack(w1), "b1": stack(b1),
        "w2": stack(w2), "b2": stack(b2),
        "ln_g": stack(ln_g), "ln_b": stack(ln_b),
    }


# ----------------------------------------------------------------------------

if __name__ == "__main__":
    # module hyper-parameters
    embed_dim = 32
    expanse_dim = 64
    kernel_size = 5        # odd -> length-preserving moving average
    corr_factor = 1.0
    n_blocks = 2
    n_heads = 4            # cancels analytically (see header note)
    dropout = 0.1          # identity in eval mode

    # input shape
    batch = 2
    seq_len = 16

    root = jax.random.PRNGKey(0)
    k_in, k_par = jax.random.split(root)
    x = jax.random.normal(k_in, (batch, seq_len, embed_dim), jnp.float32)
    params = init_encoder_params(k_par, embed_dim=embed_dim,
                                 expanse_dim=expanse_dim, n_blocks=n_blocks)

    fwd = jax.jit(functools.partial(encoder_forward, kernel_size=kernel_size,
                                    corr_factor=corr_factor, n_heads=n_heads))

    out = fwd(x, params)
    jax.block_until_ready(out)

    assert out.shape == (batch, seq_len, embed_dim)
    assert bool(jnp.all(jnp.isfinite(out)))
    print("KERNEL_OK")
</pallas_src>

<mosaic_0001>
module attributes {stable_mosaic.version = 11 : i64} {
  func.func @_encoder_kernel(%arg0: i32, %arg1: memref<1x16x32xf32, #tpu.memory_space<vmem>>, %arg2: memref<2x32x96xf32, #tpu.memory_space<vmem>>, %arg3: memref<2x1x96xf32, #tpu.memory_space<vmem>>, %arg4: memref<2x32x32xf32, #tpu.memory_space<vmem>>, %arg5: memref<2x1x32xf32, #tpu.memory_space<vmem>>, %arg6: memref<2x32x64xf32, #tpu.memory_space<vmem>>, %arg7: memref<2x1x64xf32, #tpu.memory_space<vmem>>, %arg8: memref<2x64x32xf32, #tpu.memory_space<vmem>>, %arg9: memref<2x1x32xf32, #tpu.memory_space<vmem>>, %arg10: memref<2x1x32xf32, #tpu.memory_space<vmem>>, %arg11: memref<2x1x32xf32, #tpu.memory_space<vmem>>, %arg12: memref<16x16xf32, #tpu.memory_space<vmem>>, %arg13: memref<16x16xf32, #tpu.memory_space<vmem>>, %arg14: memref<16x16xf32, #tpu.memory_space<vmem>>, %arg15: memref<1x16x32xf32, #tpu.memory_space<vmem>>) attributes {dimension_semantics = [#tpu.dimension_semantics<parallel>], iteration_bounds = array<i64: 2>, scalar_prefetch = 0 : i64, scratch_operands = 0 : i64, tpu.core_type = #tpu.core_type<tc>, window_params = [{transform_indices = @transform_0, window_bounds = array<i64: 1, 16, 32>}, {pipeline_mode = #tpu.pipeline_mode<synchronous>, transform_indices = @transform_1, window_bounds = array<i64: 2, 32, 96>}, {pipeline_mode = #tpu.pipeline_mode<synchronous>, transform_indices = @transform_2, window_bounds = array<i64: 2, 1, 96>}, {pipeline_mode = #tpu.pipeline_mode<synchronous>, transform_indices = @transform_3, window_bounds = array<i64: 2, 32, 32>}, {pipeline_mode = #tpu.pipeline_mode<synchronous>, transform_indices = @transform_4, window_bounds = array<i64: 2, 1, 32>}, {pipeline_mode = #tpu.pipeline_mode<synchronous>, transform_indices = @transform_5, window_bounds = array<i64: 2, 32, 64>}, {pipeline_mode = #tpu.pipeline_mode<synchronous>, transform_indices = @transform_6, window_bounds = array<i64: 2, 1, 64>}, {pipeline_mode = #tpu.pipeline_mode<synchronous>, transform_indices = @transform_7, window_bounds = array<i64: 2, 64, 32>}, {pipeline_mode = #tpu.pipeline_mode<synchronous>, transform_indices = @transform_8, window_bounds = array<i64: 2, 1, 32>}, {pipeline_mode = #tpu.pipeline_mode<synchronous>, transform_indices = @transform_9, window_bounds = array<i64: 2, 1, 32>}, {pipeline_mode = #tpu.pipeline_mode<synchronous>, transform_indices = @transform_10, window_bounds = array<i64: 2, 1, 32>}, {pipeline_mode = #tpu.pipeline_mode<synchronous>, transform_indices = @transform_11, window_bounds = array<i64: 16, 16>}, {pipeline_mode = #tpu.pipeline_mode<synchronous>, transform_indices = @transform_12, window_bounds = array<i64: 16, 16>}, {pipeline_mode = #tpu.pipeline_mode<synchronous>, transform_indices = @transform_13, window_bounds = array<i64: 16, 16>}, {transform_indices = @transform_14, window_bounds = array<i64: 1, 16, 32>}]} {
    %c0 = arith.constant 0 : index
    %c0_0 = arith.constant 0 : index
    %c0_1 = arith.constant 0 : index
    %0 = vector.load %arg1[%c0, %c0_0, %c0_1] : memref<1x16x32xf32, #tpu.memory_space<vmem>>, vector<1x16x32xf32>
    %1 = vector.shape_cast %0 : vector<1x16x32xf32> to vector<16x32xf32>
    %c0_2 = arith.constant 0 : index
    %c0_3 = arith.constant 0 : index
    %2 = vector.load %arg12[%c0_2, %c0_3] : memref<16x16xf32, #tpu.memory_space<vmem>>, vector<16x16xf32>
    %c0_4 = arith.constant 0 : index
    %c0_5 = arith.constant 0 : index
    %3 = vector.load %arg13[%c0_4, %c0_5] : memref<16x16xf32, #tpu.memory_space<vmem>>, vector<16x16xf32>
    %c0_6 = arith.constant 0 : index
    %c0_7 = arith.constant 0 : index
    %4 = vector.load %arg14[%c0_6, %c0_7] : memref<16x16xf32, #tpu.memory_space<vmem>>, vector<16x16xf32>
    %5 = tpu.iota {dimensions = array<i32: 0>} : vector<16x16xi32>
    %6 = tpu.iota {dimensions = array<i32: 1>} : vector<16x16xi32>
    %7 = arith.cmpi eq, %5, %6 : vector<16x16xi32>
    %8 = arith.extui %7 : vector<16x16xi1> to vector<16x16xi32>
    %9 = arith.sitofp %8 : vector<16x16xi32> to vector<16x16xf32>
    %c0_8 = arith.constant 0 : index
    %c0_9 = arith.constant 0 : index
    %c0_10 = arith.constant 0 : index
    %10 = vector.load %arg2[%c0_8, %c0_9, %c0_10] : memref<2x32x96xf32, #tpu.memory_space<vmem>>, vector<1x32x96xf32>
    %11 = vector.shape_cast %10 : vector<1x32x96xf32> to vector<32x96xf32>
    %cst = arith.constant dense<0.000000e+00> : vector<16x96xf32>
    %12 = tpu.matmul %1, %11, %cst {dimension_numbers = #tpu.dot_dimension_numbers<[1], [0], [0], [1], [0, 0, 1, 1], [], []>} : vector<16x32xf32>, vector<32x96xf32>, vector<16x96xf32> -> vector<16x96xf32>
    %c0_11 = arith.constant 0 : index
    %c0_12 = arith.constant 0 : index
    %c0_13 = arith.constant 0 : index
    %13 = vector.load %arg3[%c0_11, %c0_12, %c0_13] : memref<2x1x96xf32, #tpu.memory_space<vmem>>, vector<1x1x96xf32>
    %14 = vector.shape_cast %13 : vector<1x1x96xf32> to vector<1x96xf32>
    %15 = vector.broadcast %14 : vector<1x96xf32> to vector<16x96xf32>
    %16 = arith.addf %12, %15 : vector<16x96xf32>
    %cst_14 = arith.constant dense<0.000000e+00> : vector<16x96xf32>
    %17 = tpu.matmul %3, %16, %cst_14 {dimension_numbers = #tpu.dot_dimension_numbers<[1], [0], [0], [1], [0, 0, 1, 1], [], []>} : vector<16x16xf32>, vector<16x96xf32>, vector<16x96xf32> -> vector<16x96xf32>
    %cst_15 = arith.constant dense<0.000000e+00> : vector<16x96xf32>
    %18 = tpu.matmul %4, %16, %cst_15 {dimension_numbers = #tpu.dot_dimension_numbers<[1], [0], [0], [1], [0, 0, 1, 1], [], []>} : vector<16x16xf32>, vector<16x96xf32>, vector<16x96xf32> -> vector<16x96xf32>
    %19 = vector.extract_strided_slice %17 {offsets = [0, 0], sizes = [16, 32], strides = [1, 1]} : vector<16x96xf32> to vector<16x32xf32>
    %20 = vector.extract_strided_slice %17 {offsets = [0, 32], sizes = [16, 32], strides = [1, 1]} : vector<16x96xf32> to vector<16x32xf32>
    %21 = vector.extract_strided_slice %17 {offsets = [0, 64], sizes = [16, 32], strides = [1, 1]} : vector<16x96xf32> to vector<16x32xf32>
    %22 = vector.extract_strided_slice %18 {offsets = [0, 0], sizes = [16, 32], strides = [1, 1]} : vector<16x96xf32> to vector<16x32xf32>
    %23 = vector.extract_strided_slice %18 {offsets = [0, 32], sizes = [16, 32], strides = [1, 1]} : vector<16x96xf32> to vector<16x32xf32>
    %24 = vector.extract_strided_slice %18 {offsets = [0, 64], sizes = [16, 32], strides = [1, 1]} : vector<16x96xf32> to vector<16x32xf32>
    %25 = arith.mulf %19, %20 : vector<16x32xf32>
    %26 = arith.mulf %22, %23 : vector<16x32xf32>
    %27 = arith.addf %25, %26 : vector<16x32xf32>
    %cst_16 = arith.constant dense<0.000000e+00> : vector<16xf32>
    %28 = vector.multi_reduction <add>, %27, %cst_16 [1] : vector<16x32xf32> to vector<16xf32>
    %29 = vector.shape_cast %28 : vector<16xf32> to vector<16x1xf32>
    %cst_17 = arith.constant 0.001953125 : f32
    %30 = vector.broadcast %cst_17 : f32 to vector<16x1xf32>
    %31 = arith.mulf %29, %30 : vector<16x1xf32>
    %32 = arith.mulf %19, %23 : vector<16x32xf32>
    %33 = arith.mulf %22, %20 : vector<16x32xf32>
    %34 = arith.subf %32, %33 : vector<16x32xf32>
    %cst_18 = arith.constant dense<0.000000e+00> : vector<16xf32>
    %35 = vector.multi_reduction <add>, %34, %cst_18 [1] : vector<16x32xf32> to vector<16xf32>
    %36 = vector.shape_cast %35 : vector<16xf32> to vector<16x1xf32>
    %cst_19 = arith.constant 0.001953125 : f32
    %37 = vector.broadcast %cst_19 : f32 to vector<16x1xf32>
    %38 = arith.mulf %36, %37 : vector<16x1xf32>
    %39 = vector.broadcast %31 : vector<16x1xf32> to vector<16x16xf32>
    %40 = arith.mulf %3, %39 : vector<16x16xf32>
    %41 = vector.broadcast %38 : vector<16x1xf32> to vector<16x16xf32>
    %42 = arith.mulf %4, %41 : vector<16x16xf32>
    %43 = arith.subf %40, %42 : vector<16x16xf32>
    %cst_20 = arith.constant dense<0.000000e+00> : vector<16xf32>
    %44 = vector.multi_reduction <add>, %43, %cst_20 [0] : vector<16x16xf32> to vector<16xf32>
    %45 = vector.shape_cast %44 : vector<16xf32> to vector<1x16xf32>
    %46 = vector.broadcast %45 : vector<1x16xf32> to vector<16x16xf32>
    %47 = arith.mulf %9, %46 : vector<16x16xf32>
    %cst_21 = arith.constant dense<0.000000e+00> : vector<16xf32>
    %48 = vector.multi_reduction <add>, %47, %cst_21 [1] : vector<16x16xf32> to vector<16xf32>
    %49 = vector.shape_cast %48 : vector<16xf32> to vector<16x1xf32>
    %50 = vector.broadcast %49 : vector<16x1xf32> to vector<16x16xf32>
    %51 = vector.broadcast %45 : vector<1x16xf32> to vector<16x16xf32>
    %52 = arith.cmpf ogt, %50, %51 : vector<16x16xf32>
    %53 = vector.broadcast %49 : vector<16x1xf32> to vector<16x16xf32>
    %54 = vector.broadcast %45 : vector<1x16xf32> to vector<16x16xf32>
    %55 = arith.cmpf oeq, %53, %54 : vector<16x16xf32>
    %56 = arith.cmpi slt, %5, %6 : vector<16x16xi32>
    %57 = arith.andi %55, %56 : vector<16x16xi1>
    %58 = arith.ori %52, %57 : vector<16x16xi1>
    %59 = arith.extui %58 : vector<16x16xi1> to vector<16x16xi32>
    %60 = arith.sitofp %59 : vector<16x16xi32> to vector<16x16xf32>
    %cst_22 = arith.constant dense<0.000000e+00> : vector<16xf32>
    %61 = vector.multi_reduction <add>, %60, %cst_22 [0] : vector<16x16xf32> to vector<16xf32>
    %62 = vector.shape_cast %61 : vector<16xf32> to vector<1x16xf32>
    %cst_23 = arith.constant 2.000000e+00 : f32
    %63 = vector.broadcast %cst_23 : f32 to vector<1x16xf32>
    %64 = arith.cmpf olt, %62, %63 : vector<1x16xf32>
    %cst_24 = arith.constant 0xFF800000 : f32
    %65 = vector.broadcast %cst_24 : f32 to vector<1x16xf32>
    %66 = arith.select %64, %45, %65 : vector<1x16xi1>, vector<1x16xf32>
    %cst_25 = arith.constant dense<0xFF800000> : vector<1xf32>
    %67 = vector.multi_reduction <maximumf>, %66, %cst_25 [1] : vector<1x16xf32> to vector<1xf32>
    %68 = vector.shape_cast %67 : vector<1xf32> to vector<1x1xf32>
    %69 = vector.broadcast %68 : vector<1x1xf32> to vector<1x16xf32>
    %70 = arith.subf %45, %69 : vector<1x16xf32>
    %71 = math.exp %70 : vector<1x16xf32>
    %cst_26 = arith.constant 0.000000e+00 : f32
    %72 = vector.broadcast %cst_26 : f32 to vector<1x16xf32>
    %73 = arith.select %64, %71, %72 : vector<1x16xi1>, vector<1x16xf32>
    %cst_27 = arith.constant dense<0.000000e+00> : vector<1xf32>
    %74 = vector.multi_reduction <add>, %73, %cst_27 [1] : vector<1x16xf32> to vector<1xf32>
    %75 = vector.shape_cast %74 : vector<1xf32> to vector<1x1xf32>
    %76 = tpu.reciprocal %75 {approx = true} : vector<1x1xf32> -> vector<1x1xf32>
    %77 = vector.broadcast %76 : vector<1x1xf32> to vector<1x16xf32>
    %78 = arith.mulf %73, %77 : vector<1x16xf32>
    %cst_28 = arith.constant 6.250000e-02 : f32
    %79 = vector.broadcast %cst_28 : f32 to vector<1x16xf32>
    %80 = arith.mulf %78, %79 : vector<1x16xf32>
    %81 = vector.broadcast %80 : vector<1x16xf32> to vector<16x16xf32>
    %82 = arith.mulf %3, %81 : vector<16x16xf32>
    %cst_29 = arith.constant dense<0.000000e+00> : vector<16xf32>
    %83 = vector.multi_reduction <add>, %82, %cst_29 [1] : vector<16x16xf32> to vector<16xf32>
    %84 = vector.shape_cast %83 : vector<16xf32> to vector<16x1xf32>
    %85 = vector.broadcast %80 : vector<1x16xf32> to vector<16x16xf32>
    %86 = arith.mulf %4, %85 : vector<16x16xf32>
    %cst_30 = arith.constant dense<0.000000e+00> : vector<16xf32>
    %87 = vector.multi_reduction <add>, %86, %cst_30 [1] : vector<16x16xf32> to vector<16xf32>
    %88 = vector.shape_cast %87 : vector<16xf32> to vector<16x1xf32>
    %89 = vector.broadcast %84 : vector<16x1xf32> to vector<16x32xf32>
    %90 = arith.mulf %21, %89 : vector<16x32xf32>
    %91 = vector.broadcast %88 : vector<16x1xf32> to vector<16x32xf32>
    %92 = arith.mulf %24, %91 : vector<16x32xf32>
    %93 = arith.addf %90, %92 : vector<16x32xf32>
    %94 = vector.broadcast %88 : vector<16x1xf32> to vector<16x32xf32>
    %95 = arith.mulf %21, %94 : vector<16x32xf32>
    %96 = vector.broadcast %84 : vector<16x1xf32> to vector<16x32xf32>
    %97 = arith.mulf %24, %96 : vector<16x32xf32>
    %98 = arith.subf %95, %97 : vector<16x32xf32>
    %cst_31 = arith.constant dense<0.000000e+00> : vector<16x32xf32>
    %99 = tpu.matmul %3, %93, %cst_31 {dimension_numbers = #tpu.dot_dimension_numbers<[1], [0], [0], [1], [0, 0, 1, 1], [], []>} : vector<16x16xf32>, vector<16x32xf32>, vector<16x32xf32> -> vector<16x32xf32>
    %cst_32 = arith.constant dense<0.000000e+00> : vector<16x32xf32>
    %100 = tpu.matmul %4, %98, %cst_32 {dimension_numbers = #tpu.dot_dimension_numbers<[1], [0], [0], [1], [0, 0, 1, 1], [], []>} : vector<16x16xf32>, vector<16x32xf32>, vector<16x32xf32> -> vector<16x32xf32>
    %101 = arith.subf %99, %100 : vector<16x32xf32>
    %c0_33 = arith.constant 0 : index
    %c0_34 = arith.constant 0 : index
    %c0_35 = arith.constant 0 : index
    %102 = vector.load %arg4[%c0_33, %c0_34, %c0_35] : memref<2x32x32xf32, #tpu.memory_space<vmem>>, vector<1x32x32xf32>
    %103 = vector.shape_cast %102 : vector<1x32x32xf32> to vector<32x32xf32>
    %cst_36 = arith.constant dense<0.000000e+00> : vector<16x32xf32>
    %104 = tpu.matmul %101, %103, %cst_36 {dimension_numbers = #tpu.dot_dimension_numbers<[1], [0], [0], [1], [0, 0, 1, 1], [], []>} : vector<16x32xf32>, vector<32x32xf32>, vector<16x32xf32> -> vector<16x32xf32>
    %c0_37 = arith.constant 0 : index
    %c0_38 = arith.constant 0 : index
    %c0_39 = arith.constant 0 : index
    %105 = vector.load %arg5[%c0_37, %c0_38, %c0_39] : memref<2x1x32xf32, #tpu.memory_space<vmem>>, vector<1x1x32xf32>
    %106 = vector.shape_cast %105 : vector<1x1x32xf32> to vector<1x32xf32>
    %107 = vector.broadcast %106 : vector<1x32xf32> to vector<16x32xf32>
    %108 = arith.addf %104, %107 : vector<16x32xf32>
    %109 = arith.addf %1, %108 : vector<16x32xf32>
    %cst_40 = arith.constant dense<0.000000e+00> : vector<16x32xf32>
    %110 = tpu.matmul %2, %109, %cst_40 {dimension_numbers = #tpu.dot_dimension_numbers<[1], [0], [0], [1], [0, 0, 1, 1], [], []>} : vector<16x16xf32>, vector<16x32xf32>, vector<16x32xf32> -> vector<16x32xf32>
    %c0_41 = arith.constant 0 : index
    %c0_42 = arith.constant 0 : index
    %c0_43 = arith.constant 0 : index
    %111 = vector.load %arg6[%c0_41, %c0_42, %c0_43] : memref<2x32x64xf32, #tpu.memory_space<vmem>>, vector<1x32x64xf32>
    %112 = vector.shape_cast %111 : vector<1x32x64xf32> to vector<32x64xf32>
    %cst_44 = arith.constant dense<0.000000e+00> : vector<16x64xf32>
    %113 = tpu.matmul %110, %112, %cst_44 {dimension_numbers = #tpu.dot_dimension_numbers<[1], [0], [0], [1], [0, 0, 1, 1], [], []>} : vector<16x32xf32>, vector<32x64xf32>, vector<16x64xf32> -> vector<16x64xf32>
    %c0_45 = arith.constant 0 : index
    %c0_46 = arith.constant 0 : index
    %c0_47 = arith.constant 0 : index
    %114 = vector.load %arg7[%c0_45, %c0_46, %c0_47] : memref<2x1x64xf32, #tpu.memory_space<vmem>>, vector<1x1x64xf32>
    %115 = vector.shape_cast %114 : vector<1x1x64xf32> to vector<1x64xf32>
    %116 = vector.broadcast %115 : vector<1x64xf32> to vector<16x64xf32>
    %117 = arith.addf %113, %116 : vector<16x64xf32>
    %cst_48 = arith.constant 5.000000e-01 : f32
    %118 = vector.broadcast %cst_48 : f32 to vector<16x64xf32>
    %119 = arith.mulf %118, %117 : vector<16x64xf32>
    %cst_49 = arith.constant 0.707106769 : f32
    %120 = vector.broadcast %cst_49 : f32 to vector<16x64xf32>
    %121 = arith.mulf %117, %120 : vector<16x64xf32>
    %122 = math.erf %121 : vector<16x64xf32>
    %cst_50 = arith.constant 1.000000e+00 : f32
    %123 = vector.broadcast %cst_50 : f32 to vector<16x64xf32>
    %124 = arith.addf %123, %122 : vector<16x64xf32>
    %125 = arith.mulf %119, %124 : vector<16x64xf32>
    %c0_51 = arith.constant 0 : index
    %c0_52 = arith.constant 0 : index
    %c0_53 = arith.constant 0 : index
    %126 = vector.load %arg8[%c0_51, %c0_52, %c0_53] : memref<2x64x32xf32, #tpu.memory_space<vmem>>, vector<1x64x32xf32>
    %127 = vector.shape_cast %126 : vector<1x64x32xf32> to vector<64x32xf32>
    %cst_54 = arith.constant dense<0.000000e+00> : vector<16x32xf32>
    %128 = tpu.matmul %125, %127, %cst_54 {dimension_numbers = #tpu.dot_dimension_numbers<[1], [0], [0], [1], [0, 0, 1, 1], [], []>} : vector<16x64xf32>, vector<64x32xf32>, vector<16x32xf32> -> vector<16x32xf32>
    %c0_55 = arith.constant 0 : index
    %c0_56 = arith.constant 0 : index
    %c0_57 = arith.constant 0 : index
    %129 = vector.load %arg9[%c0_55, %c0_56, %c0_57] : memref<2x1x32xf32, #tpu.memory_space<vmem>>, vector<1x1x32xf32>
    %130 = vector.shape_cast %129 : vector<1x1x32xf32> to vector<1x32xf32>
    %131 = vector.broadcast %130 : vector<1x32xf32> to vector<16x32xf32>
    %132 = arith.addf %128, %131 : vector<16x32xf32>
    %133 = arith.addf %110, %132 : vector<16x32xf32>
    %cst_58 = arith.constant dense<0.000000e+00> : vector<16x32xf32>
    %134 = tpu.matmul %2, %133, %cst_58 {dimension_numbers = #tpu.dot_dimension_numbers<[1], [0], [0], [1], [0, 0, 1, 1], [], []>} : vector<16x16xf32>, vector<16x32xf32>, vector<16x32xf32> -> vector<16x32xf32>
    %cst_59 = arith.constant dense<0.000000e+00> : vector<16xf32>
    %135 = vector.multi_reduction <add>, %134, %cst_59 [1] : vector<16x32xf32> to vector<16xf32>
    %136 = vector.shape_cast %135 : vector<16xf32> to vector<16x1xf32>
    %cst_60 = arith.constant 3.200000e+01 : f32
    %137 = vector.broadcast %cst_60 : f32 to vector<16x1xf32>
    %138 = arith.divf %136, %137 : vector<16x1xf32>
    %139 = vector.broadcast %138 : vector<16x1xf32> to vector<16x32xf32>
    %140 = arith.subf %134, %139 : vector<16x32xf32>
    %141 = arith.mulf %140, %140 : vector<16x32xf32>
    %cst_61 = arith.constant dense<0.000000e+00> : vector<16xf32>
    %142 = vector.multi_reduction <add>, %141, %cst_61 [1] : vector<16x32xf32> to vector<16xf32>
    %143 = vector.shape_cast %142 : vector<16xf32> to vector<16x1xf32>
    %cst_62 = arith.constant 3.200000e+01 : f32
    %144 = vector.broadcast %cst_62 : f32 to vector<16x1xf32>
    %145 = arith.divf %143, %144 : vector<16x1xf32>
    %146 = vector.broadcast %138 : vector<16x1xf32> to vector<16x32xf32>
    %147 = arith.subf %134, %146 : vector<16x32xf32>
    %cst_63 = arith.constant 9.99999974E-6 : f32
    %148 = vector.broadcast %cst_63 : f32 to vector<16x1xf32>
    %149 = arith.addf %145, %148 : vector<16x1xf32>
    %150 = math.rsqrt %149 : vector<16x1xf32>
    %151 = vector.broadcast %150 : vector<16x1xf32> to vector<16x32xf32>
    %152 = arith.mulf %147, %151 : vector<16x32xf32>
    %c0_64 = arith.constant 0 : index
    %c0_65 = arith.constant 0 : index
    %c0_66 = arith.constant 0 : index
    %153 = vector.load %arg10[%c0_64, %c0_65, %c0_66] : memref<2x1x32xf32, #tpu.memory_space<vmem>>, vector<1x1x32xf32>
    %154 = vector.shape_cast %153 : vector<1x1x32xf32> to vector<1x32xf32>
    %155 = vector.broadcast %154 : vector<1x32xf32> to vector<16x32xf32>
    %156 = arith.mulf %152, %155 : vector<16x32xf32>
    %c0_67 = arith.constant 0 : index
    %c0_68 = arith.constant 0 : index
    %c0_69 = arith.constant 0 : index
    %157 = vector.load %arg11[%c0_67, %c0_68, %c0_69] : memref<2x1x32xf32, #tpu.memory_space<vmem>>, vector<1x1x32xf32>
    %158 = vector.shape_cast %157 : vector<1x1x32xf32> to vector<1x32xf32>
    %159 = vector.broadcast %158 : vector<1x32xf32> to vector<16x32xf32>
    %160 = arith.addf %156, %159 : vector<16x32xf32>
    %cst_70 = arith.constant dense<0.000000e+00> : vector<32xf32>
    %161 = vector.multi_reduction <add>, %160, %cst_70 [0] : vector<16x32xf32> to vector<32xf32>
    %162 = vector.shape_cast %161 : vector<32xf32> to vector<1x32xf32>
    %cst_71 = arith.constant 1.600000e+01 : f32
    %163 = vector.broadcast %cst_71 : f32 to vector<1x32xf32>
    %164 = arith.divf %162, %163 : vector<1x32xf32>
    %165 = vector.broadcast %164 : vector<1x32xf32> to vector<16x32xf32>
    %166 = arith.subf %160, %165 : vector<16x32xf32>
    %c1 = arith.constant 1 : index
    %c0_72 = arith.constant 0 : index
    %c0_73 = arith.constant 0 : index
    %167 = vector.load %arg2[%c1, %c0_72, %c0_73] : memref<2x32x96xf32, #tpu.memory_space<vmem>>, vector<1x32x96xf32>
    %168 = vector.shape_cast %167 : vector<1x32x96xf32> to vector<32x96xf32>
    %cst_74 = arith.constant dense<0.000000e+00> : vector<16x96xf32>
    %169 = tpu.matmul %166, %168, %cst_74 {dimension_numbers = #tpu.dot_dimension_numbers<[1], [0], [0], [1], [0, 0, 1, 1], [], []>} : vector<16x32xf32>, vector<32x96xf32>, vector<16x96xf32> -> vector<16x96xf32>
    %c1_75 = arith.constant 1 : index
    %c0_76 = arith.constant 0 : index
    %c0_77 = arith.constant 0 : index
    %170 = vector.load %arg3[%c1_75, %c0_76, %c0_77] : memref<2x1x96xf32, #tpu.memory_space<vmem>>, vector<1x1x96xf32>
    %171 = vector.shape_cast %170 : vector<1x1x96xf32> to vector<1x96xf32>
    %172 = vector.broadcast %171 : vector<1x96xf32> to vector<16x96xf32>
    %173 = arith.addf %169, %172 : vector<16x96xf32>
    %cst_78 = arith.constant dense<0.000000e+00> : vector<16x96xf32>
    %174 = tpu.matmul %3, %173, %cst_78 {dimension_numbers = #tpu.dot_dimension_numbers<[1], [0], [0], [1], [0, 0, 1, 1], [], []>} : vector<16x16xf32>, vector<16x96xf32>, vector<16x96xf32> -> vector<16x96xf32>
    %cst_79 = arith.constant dense<0.000000e+00> : vector<16x96xf32>
    %175 = tpu.matmul %4, %173, %cst_79 {dimension_numbers = #tpu.dot_dimension_numbers<[1], [0], [0], [1], [0, 0, 1, 1], [], []>} : vector<16x16xf32>, vector<16x96xf32>, vector<16x96xf32> -> vector<16x96xf32>
    %176 = vector.extract_strided_slice %174 {offsets = [0, 0], sizes = [16, 32], strides = [1, 1]} : vector<16x96xf32> to vector<16x32xf32>
    %177 = vector.extract_strided_slice %174 {offsets = [0, 32], sizes = [16, 32], strides = [1, 1]} : vector<16x96xf32> to vector<16x32xf32>
    %178 = vector.extract_strided_slice %174 {offsets = [0, 64], sizes = [16, 32], strides = [1, 1]} : vector<16x96xf32> to vector<16x32xf32>
    %179 = vector.extract_strided_slice %175 {offsets = [0, 0], sizes = [16, 32], strides = [1, 1]} : vector<16x96xf32> to vector<16x32xf32>
    %180 = vector.extract_strided_slice %175 {offsets = [0, 32], sizes = [16, 32], strides = [1, 1]} : vector<16x96xf32> to vector<16x32xf32>
    %181 = vector.extract_strided_slice %175 {offsets = [0, 64], sizes = [16, 32], strides = [1, 1]} : vector<16x96xf32> to vector<16x32xf32>
    %182 = arith.mulf %176, %177 : vector<16x32xf32>
    %183 = arith.mulf %179, %180 : vector<16x32xf32>
    %184 = arith.addf %182, %183 : vector<16x32xf32>
    %cst_80 = arith.constant dense<0.000000e+00> : vector<16xf32>
    %185 = vector.multi_reduction <add>, %184, %cst_80 [1] : vector<16x32xf32> to vector<16xf32>
    %186 = vector.shape_cast %185 : vector<16xf32> to vector<16x1xf32>
    %cst_81 = arith.constant 0.001953125 : f32
    %187 = vector.broadcast %cst_81 : f32 to vector<16x1xf32>
    %188 = arith.mulf %186, %187 : vector<16x1xf32>
    %189 = arith.mulf %176, %180 : vector<16x32xf32>
    %190 = arith.mulf %179, %177 : vector<16x32xf32>
    %191 = arith.subf %189, %190 : vector<16x32xf32>
    %cst_82 = arith.constant dense<0.000000e+00> : vector<16xf32>
    %192 = vector.multi_reduction <add>, %191, %cst_82 [1] : vector<16x32xf32> to vector<16xf32>
    %193 = vector.shape_cast %192 : vector<16xf32> to vector<16x1xf32>
    %cst_83 = arith.constant 0.001953125 : f32
    %194 = vector.broadcast %cst_83 : f32 to vector<16x1xf32>
    %195 = arith.mulf %193, %194 : vector<16x1xf32>
    %196 = vector.broadcast %188 : vector<16x1xf32> to vector<16x16xf32>
    %197 = arith.mulf %3, %196 : vector<16x16xf32>
    %198 = vector.broadcast %195 : vector<16x1xf32> to vector<16x16xf32>
    %199 = arith.mulf %4, %198 : vector<16x16xf32>
    %200 = arith.subf %197, %199 : vector<16x16xf32>
    %cst_84 = arith.constant dense<0.000000e+00> : vector<16xf32>
    %201 = vector.multi_reduction <add>, %200, %cst_84 [0] : vector<16x16xf32> to vector<16xf32>
    %202 = vector.shape_cast %201 : vector<16xf32> to vector<1x16xf32>
    %203 = vector.broadcast %202 : vector<1x16xf32> to vector<16x16xf32>
    %204 = arith.mulf %9, %203 : vector<16x16xf32>
    %cst_85 = arith.constant dense<0.000000e+00> : vector<16xf32>
    %205 = vector.multi_reduction <add>, %204, %cst_85 [1] : vector<16x16xf32> to vector<16xf32>
    %206 = vector.shape_cast %205 : vector<16xf32> to vector<16x1xf32>
    %207 = vector.broadcast %206 : vector<16x1xf32> to vector<16x16xf32>
    %208 = vector.broadcast %202 : vector<1x16xf32> to vector<16x16xf32>
    %209 = arith.cmpf ogt, %207, %208 : vector<16x16xf32>
    %210 = vector.broadcast %206 : vector<16x1xf32> to vector<16x16xf32>
    %211 = vector.broadcast %202 : vector<1x16xf32> to vector<16x16xf32>
    %212 = arith.cmpf oeq, %210, %211 : vector<16x16xf32>
    %213 = arith.cmpi slt, %5, %6 : vector<16x16xi32>
    %214 = arith.andi %212, %213 : vector<16x16xi1>
    %215 = arith.ori %209, %214 : vector<16x16xi1>
    %216 = arith.extui %215 : vector<16x16xi1> to vector<16x16xi32>
    %217 = arith.sitofp %216 : vector<16x16xi32> to vector<16x16xf32>
    %cst_86 = arith.constant dense<0.000000e+00> : vector<16xf32>
    %218 = vector.multi_reduction <add>, %217, %cst_86 [0] : vector<16x16xf32> to vector<16xf32>
    %219 = vector.shape_cast %218 : vector<16xf32> to vector<1x16xf32>
    %cst_87 = arith.constant 2.000000e+00 : f32
    %220 = vector.broadcast %cst_87 : f32 to vector<1x16xf32>
    %221 = arith.cmpf olt, %219, %220 : vector<1x16xf32>
    %cst_88 = arith.constant 0xFF800000 : f32
    %222 = vector.broadcast %cst_88 : f32 to vector<1x16xf32>
    %223 = arith.select %221, %202, %222 : vector<1x16xi1>, vector<1x16xf32>
    %cst_89 = arith.constant dense<0xFF800000> : vector<1xf32>
    %224 = vector.multi_reduction <maximumf>, %223, %cst_89 [1] : vector<1x16xf32> to vector<1xf32>
    %225 = vector.shape_cast %224 : vector<1xf32> to vector<1x1xf32>
    %226 = vector.broadcast %225 : vector<1x1xf32> to vector<1x16xf32>
    %227 = arith.subf %202, %226 : vector<1x16xf32>
    %228 = math.exp %227 : vector<1x16xf32>
    %cst_90 = arith.constant 0.000000e+00 : f32
    %229 = vector.broadcast %cst_90 : f32 to vector<1x16xf32>
    %230 = arith.select %221, %228, %229 : vector<1x16xi1>, vector<1x16xf32>
    %cst_91 = arith.constant dense<0.000000e+00> : vector<1xf32>
    %231 = vector.multi_reduction <add>, %230, %cst_91 [1] : vector<1x16xf32> to vector<1xf32>
    %232 = vector.shape_cast %231 : vector<1xf32> to vector<1x1xf32>
    %233 = tpu.reciprocal %232 {approx = true} : vector<1x1xf32> -> vector<1x1xf32>
    %234 = vector.broadcast %233 : vector<1x1xf32> to vector<1x16xf32>
    %235 = arith.mulf %230, %234 : vector<1x16xf32>
    %cst_92 = arith.constant 6.250000e-02 : f32
    %236 = vector.broadcast %cst_92 : f32 to vector<1x16xf32>
    %237 = arith.mulf %235, %236 : vector<1x16xf32>
    %238 = vector.broadcast %237 : vector<1x16xf32> to vector<16x16xf32>
    %239 = arith.mulf %3, %238 : vector<16x16xf32>
    %cst_93 = arith.constant dense<0.000000e+00> : vector<16xf32>
    %240 = vector.multi_reduction <add>, %239, %cst_93 [1] : vector<16x16xf32> to vector<16xf32>
    %241 = vector.shape_cast %240 : vector<16xf32> to vector<16x1xf32>
    %242 = vector.broadcast %237 : vector<1x16xf32> to vector<16x16xf32>
    %243 = arith.mulf %4, %242 : vector<16x16xf32>
    %cst_94 = arith.constant dense<0.000000e+00> : vector<16xf32>
    %244 = vector.multi_reduction <add>, %243, %cst_94 [1] : vector<16x16xf32> to vector<16xf32>
    %245 = vector.shape_cast %244 : vector<16xf32> to vector<16x1xf32>
    %246 = vector.broadcast %241 : vector<16x1xf32> to vector<16x32xf32>
    %247 = arith.mulf %178, %246 : vector<16x32xf32>
    %248 = vector.broadcast %245 : vector<16x1xf32> to vector<16x32xf32>
    %249 = arith.mulf %181, %248 : vector<16x32xf32>
    %250 = arith.addf %247, %249 : vector<16x32xf32>
    %251 = vector.broadcast %245 : vector<16x1xf32> to vector<16x32xf32>
    %252 = arith.mulf %178, %251 : vector<16x32xf32>
    %253 = vector.broadcast %241 : vector<16x1xf32> to vector<16x32xf32>
    %254 = arith.mulf %181, %253 : vector<16x32xf32>
    %255 = arith.subf %252, %254 : vector<16x32xf32>
    %cst_95 = arith.constant dense<0.000000e+00> : vector<16x32xf32>
    %256 = tpu.matmul %3, %250, %cst_95 {dimension_numbers = #tpu.dot_dimension_numbers<[1], [0], [0], [1], [0, 0, 1, 1], [], []>} : vector<16x16xf32>, vector<16x32xf32>, vector<16x32xf32> -> vector<16x32xf32>
    %cst_96 = arith.constant dense<0.000000e+00> : vector<16x32xf32>
    %257 = tpu.matmul %4, %255, %cst_96 {dimension_numbers = #tpu.dot_dimension_numbers<[1], [0], [0], [1], [0, 0, 1, 1], [], []>} : vector<16x16xf32>, vector<16x32xf32>, vector<16x32xf32> -> vector<16x32xf32>
    %258 = arith.subf %256, %257 : vector<16x32xf32>
    %c1_97 = arith.constant 1 : index
    %c0_98 = arith.constant 0 : index
    %c0_99 = arith.constant 0 : index
    %259 = vector.load %arg4[%c1_97, %c0_98, %c0_99] : memref<2x32x32xf32, #tpu.memory_space<vmem>>, vector<1x32x32xf32>
    %260 = vector.shape_cast %259 : vector<1x32x32xf32> to vector<32x32xf32>
    %cst_100 = arith.constant dense<0.000000e+00> : vector<16x32xf32>
    %261 = tpu.matmul %258, %260, %cst_100 {dimension_numbers = #tpu.dot_dimension_numbers<[1], [0], [0], [1], [0, 0, 1, 1], [], []>} : vector<16x32xf32>, vector<32x32xf32>, vector<16x32xf32> -> vector<16x32xf32>
    %c1_101 = arith.constant 1 : index
    %c0_102 = arith.constant 0 : index
    %c0_103 = arith.constant 0 : index
    %262 = vector.load %arg5[%c1_101, %c0_102, %c0_103] : memref<2x1x32xf32, #tpu.memory_space<vmem>>, vector<1x1x32xf32>
    %263 = vector.shape_cast %262 : vector<1x1x32xf32> to vector<1x32xf32>
    %264 = vector.broadcast %263 : vector<1x32xf32> to vector<16x32xf32>
    %265 = arith.addf %261, %264 : vector<16x32xf32>
    %266 = arith.addf %166, %265 : vector<16x32xf32>
    %cst_104 = arith.constant dense<0.000000e+00> : vector<16x32xf32>
    %267 = tpu.matmul %2, %266, %cst_104 {dimension_numbers = #tpu.dot_dimension_numbers<[1], [0], [0], [1], [0, 0, 1, 1], [], []>} : vector<16x16xf32>, vector<16x32xf32>, vector<16x32xf32> -> vector<16x32xf32>
    %c1_105 = arith.constant 1 : index
    %c0_106 = arith.constant 0 : index
    %c0_107 = arith.constant 0 : index
    %268 = vector.load %arg6[%c1_105, %c0_106, %c0_107] : memref<2x32x64xf32, #tpu.memory_space<vmem>>, vector<1x32x64xf32>
    %269 = vector.shape_cast %268 : vector<1x32x64xf32> to vector<32x64xf32>
    %cst_108 = arith.constant dense<0.000000e+00> : vector<16x64xf32>
    %270 = tpu.matmul %267, %269, %cst_108 {dimension_numbers = #tpu.dot_dimension_numbers<[1], [0], [0], [1], [0, 0, 1, 1], [], []>} : vector<16x32xf32>, vector<32x64xf32>, vector<16x64xf32> -> vector<16x64xf32>
    %c1_109 = arith.constant 1 : index
    %c0_110 = arith.constant 0 : index
    %c0_111 = arith.constant 0 : index
    %271 = vector.load %arg7[%c1_109, %c0_110, %c0_111] : memref<2x1x64xf32, #tpu.memory_space<vmem>>, vector<1x1x64xf32>
    %272 = vector.shape_cast %271 : vector<1x1x64xf32> to vector<1x64xf32>
    %273 = vector.broadcast %272 : vector<1x64xf32> to vector<16x64xf32>
    %274 = arith.addf %270, %273 : vector<16x64xf32>
    %cst_112 = arith.constant 5.000000e-01 : f32
    %275 = vector.broadcast %cst_112 : f32 to vector<16x64xf32>
    %276 = arith.mulf %275, %274 : vector<16x64xf32>
    %cst_113 = arith.constant 0.707106769 : f32
    %277 = vector.broadcast %cst_113 : f32 to vector<16x64xf32>
    %278 = arith.mulf %274, %277 : vector<16x64xf32>
    %279 = math.erf %278 : vector<16x64xf32>
    %cst_114 = arith.constant 1.000000e+00 : f32
    %280 = vector.broadcast %cst_114 : f32 to vector<16x64xf32>
    %281 = arith.addf %280, %279 : vector<16x64xf32>
    %282 = arith.mulf %276, %281 : vector<16x64xf32>
    %c1_115 = arith.constant 1 : index
    %c0_116 = arith.constant 0 : index
    %c0_117 = arith.constant 0 : index
    %283 = vector.load %arg8[%c1_115, %c0_116, %c0_117] : memref<2x64x32xf32, #tpu.memory_space<vmem>>, vector<1x64x32xf32>
    %284 = vector.shape_cast %283 : vector<1x64x32xf32> to vector<64x32xf32>
    %cst_118 = arith.constant dense<0.000000e+00> : vector<16x32xf32>
    %285 = tpu.matmul %282, %284, %cst_118 {dimension_numbers = #tpu.dot_dimension_numbers<[1], [0], [0], [1], [0, 0, 1, 1], [], []>} : vector<16x64xf32>, vector<64x32xf32>, vector<16x32xf32> -> vector<16x32xf32>
    %c1_119 = arith.constant 1 : index
    %c0_120 = arith.constant 0 : index
    %c0_121 = arith.constant 0 : index
    %286 = vector.load %arg9[%c1_119, %c0_120, %c0_121] : memref<2x1x32xf32, #tpu.memory_space<vmem>>, vector<1x1x32xf32>
    %287 = vector.shape_cast %286 : vector<1x1x32xf32> to vector<1x32xf32>
    %288 = vector.broadcast %287 : vector<1x32xf32> to vector<16x32xf32>
    %289 = arith.addf %285, %288 : vector<16x32xf32>
    %290 = arith.addf %267, %289 : vector<16x32xf32>
    %cst_122 = arith.constant dense<0.000000e+00> : vector<16x32xf32>
    %291 = tpu.matmul %2, %290, %cst_122 {dimension_numbers = #tpu.dot_dimension_numbers<[1], [0], [0], [1], [0, 0, 1, 1], [], []>} : vector<16x16xf32>, vector<16x32xf32>, vector<16x32xf32> -> vector<16x32xf32>
    %cst_123 = arith.constant dense<0.000000e+00> : vector<16xf32>
    %292 = vector.multi_reduction <add>, %291, %cst_123 [1] : vector<16x32xf32> to vector<16xf32>
    %293 = vector.shape_cast %292 : vector<16xf32> to vector<16x1xf32>
    %cst_124 = arith.constant 3.200000e+01 : f32
    %294 = vector.broadcast %cst_124 : f32 to vector<16x1xf32>
    %295 = arith.divf %293, %294 : vector<16x1xf32>
    %296 = vector.broadcast %295 : vector<16x1xf32> to vector<16x32xf32>
    %297 = arith.subf %291, %296 : vector<16x32xf32>
    %298 = arith.mulf %297, %297 : vector<16x32xf32>
    %cst_125 = arith.constant dense<0.000000e+00> : vector<16xf32>
    %299 = vector.multi_reduction <add>, %298, %cst_125 [1] : vector<16x32xf32> to vector<16xf32>
    %300 = vector.shape_cast %299 : vector<16xf32> to vector<16x1xf32>
    %cst_126 = arith.constant 3.200000e+01 : f32
    %301 = vector.broadcast %cst_126 : f32 to vector<16x1xf32>
    %302 = arith.divf %300, %301 : vector<16x1xf32>
    %303 = vector.broadcast %295 : vector<16x1xf32> to vector<16x32xf32>
    %304 = arith.subf %291, %303 : vector<16x32xf32>
    %cst_127 = arith.constant 9.99999974E-6 : f32
    %305 = vector.broadcast %cst_127 : f32 to vector<16x1xf32>
    %306 = arith.addf %302, %305 : vector<16x1xf32>
    %307 = math.rsqrt %306 : vector<16x1xf32>
    %308 = vector.broadcast %307 : vector<16x1xf32> to vector<16x32xf32>
    %309 = arith.mulf %304, %308 : vector<16x32xf32>
    %c1_128 = arith.constant 1 : index
    %c0_129 = arith.constant 0 : index
    %c0_130 = arith.constant 0 : index
    %310 = vector.load %arg10[%c1_128, %c0_129, %c0_130] : memref<2x1x32xf32, #tpu.memory_space<vmem>>, vector<1x1x32xf32>
    %311 = vector.shape_cast %310 : vector<1x1x32xf32> to vector<1x32xf32>
    %312 = vector.broadcast %311 : vector<1x32xf32> to vector<16x32xf32>
    %313 = arith.mulf %309, %312 : vector<16x32xf32>
    %c1_131 = arith.constant 1 : index
    %c0_132 = arith.constant 0 : index
    %c0_133 = arith.constant 0 : index
    %314 = vector.load %arg11[%c1_131, %c0_132, %c0_133] : memref<2x1x32xf32, #tpu.memory_space<vmem>>, vector<1x1x32xf32>
    %315 = vector.shape_cast %314 : vector<1x1x32xf32> to vector<1x32xf32>
    %316 = vector.broadcast %315 : vector<1x32xf32> to vector<16x32xf32>
    %317 = arith.addf %313, %316 : vector<16x32xf32>
    %cst_134 = arith.constant dense<0.000000e+00> : vector<32xf32>
    %318 = vector.multi_reduction <add>, %317, %cst_134 [0] : vector<16x32xf32> to vector<32xf32>
    %319 = vector.shape_cast %318 : vector<32xf32> to vector<1x32xf32>
    %cst_135 = arith.constant 1.600000e+01 : f32
    %320 = vector.broadcast %cst_135 : f32 to vector<1x32xf32>
    %321 = arith.divf %319, %320 : vector<1x32xf32>
    %322 = vector.broadcast %321 : vector<1x32xf32> to vector<16x32xf32>
    %323 = arith.subf %317, %322 : vector<16x32xf32>
    %c0_136 = arith.constant 0 : index
    %c0_137 = arith.constant 0 : index
    %c0_138 = arith.constant 0 : index
    %324 = vector.load %arg15[%c0_136, %c0_137, %c0_138] : memref<1x16x32xf32, #tpu.memory_space<vmem>>, vector<1x16x32xf32>
    %325 = vector.shape_cast %324 : vector<1x16x32xf32> to vector<16x32xf32>
    %326 = vector.shape_cast %323 : vector<16x32xf32> to vector<1x16x32xf32>
    tpu.vector_store %arg15[%c0_136, %c0_137, %c0_138], %326 {strides = array<i32>} : memref<1x16x32xf32, #tpu.memory_space<vmem>>, vector<1x16x32xf32>,
    return
  }
  func.func @transform_0(%arg0: i32) -> (i32, i32, i32) {
    %c0_i32 = arith.constant 0 : i32
    %c0_i32_0 = arith.constant 0 : i32
    %c0_i32_1 = arith.constant 0 : i32
    return %arg0, %c0_i32, %c0_i32_0 : i32, i32, i32
  }
  func.func @transform_1(%arg0: i32) -> (i32, i32, i32) {
    %c0_i32 = arith.constant 0 : i32
    %c0_i32_0 = arith.constant 0 : i32
    %c0_i32_1 = arith.constant 0 : i32
    %c0_i32_2 = arith.constant 0 : i32
    return %c0_i32, %c0_i32_0, %c0_i32_1 : i32, i32, i32
  }
  func.func @transform_2(%arg0: i32) -> (i32, i32, i32) {
    %c0_i32 = arith.constant 0 : i32
    %c0_i32_0 = arith.constant 0 : i32
    %c0_i32_1 = arith.constant 0 : i32
    %c0_i32_2 = arith.constant 0 : i32
    return %c0_i32, %c0_i32_0, %c0_i32_1 : i32, i32, i32
  }
  func.func @transform_3(%arg0: i32) -> (i32, i32, i32) {
    %c0_i32 = arith.constant 0 : i32
    %c0_i32_0 = arith.constant 0 : i32
    %c0_i32_1 = arith.constant 0 : i32
    %c0_i32_2 = arith.constant 0 : i32
    return %c0_i32, %c0_i32_0, %c0_i32_1 : i32, i32, i32
  }
  func.func @transform_4(%arg0: i32) -> (i32, i32, i32) {
    %c0_i32 = arith.constant 0 : i32
    %c0_i32_0 = arith.constant 0 : i32
    %c0_i32_1 = arith.constant 0 : i32
    %c0_i32_2 = arith.constant 0 : i32
    return %c0_i32, %c0_i32_0, %c0_i32_1 : i32, i32, i32
  }
  func.func @transform_5(%arg0: i32) -> (i32, i32, i32) {
    %c0_i32 = arith.constant 0 : i32
    %c0_i32_0 = arith.constant 0 : i32
    %c0_i32_1 = arith.constant 0 : i32
    %c0_i32_2 = arith.constant 0 : i32
    return %c0_i32, %c0_i32_0, %c0_i32_1 : i32, i32, i32
  }
  func.func @transform_6(%arg0: i32) -> (i32, i32, i32) {
    %c0_i32 = arith.constant 0 : i32
    %c0_i32_0 = arith.constant 0 : i32
    %c0_i32_1 = arith.constant 0 : i32
    %c0_i32_2 = arith.constant 0 : i32
    return %c0_i32, %c0_i32_0, %c0_i32_1 : i32, i32, i32
  }
  func.func @transform_7(%arg0: i32) -> (i32, i32, i32) {
    %c0_i32 = arith.constant 0 : i32
    %c0_i32_0 = arith.constant 0 : i32
    %c0_i32_1 = arith.constant 0 : i32
    %c0_i32_2 = arith.constant 0 : i32
    return %c0_i32, %c0_i32_0, %c0_i32_1 : i32, i32, i32
  }
  func.func @transform_8(%arg0: i32) -> (i32, i32, i32) {
    %c0_i32 = arith.constant 0 : i32
    %c0_i32_0 = arith.constant 0 : i32
    %c0_i32_1 = arith.constant 0 : i32
    %c0_i32_2 = arith.constant 0 : i32
    return %c0_i32, %c0_i32_0, %c0_i32_1 : i32, i32, i32
  }
  func.func @transform_9(%arg0: i32) -> (i32, i32, i32) {
    %c0_i32 = arith.constant 0 : i32
    %c0_i32_0 = arith.constant 0 : i32
    %c0_i32_1 = arith.constant 0 : i32
    %c0_i32_2 = arith.constant 0 : i32
    return %c0_i32, %c0_i32_0, %c0_i32_1 : i32, i32, i32
  }
  func.func @transform_10(%arg0: i32) -> (i32, i32, i32) {
    %c0_i32 = arith.constant 0 : i32
    %c0_i32_0 = arith.constant 0 : i32
    %c0_i32_1 = arith.constant 0 : i32
    %c0_i32_2 = arith.constant 0 : i32
    return %c0_i32, %c0_i32_0, %c0_i32_1 : i32, i32, i32
  }
  func.func @transform_11(%arg0: i32) -> (i32, i32) {
    %c0_i32 = arith.constant 0 : i32
    %c0_i32_0 = arith.constant 0 : i32
    %c0_i32_1 = arith.constant 0 : i32
    return %c0_i32, %c0_i32_0 : i32, i32
  }
  func.func @transform_12(%arg0: i32) -> (i32, i32) {
    %c0_i32 = arith.constant 0 : i32
    %c0_i32_0 = arith.constant 0 : i32
    %c0_i32_1 = arith.constant 0 : i32
    return %c0_i32, %c0_i32_0 : i32, i32
  }
  func.func @transform_13(%arg0: i32) -> (i32, i32) {
    %c0_i32 = arith.constant 0 : i32
    %c0_i32_0 = arith.constant 0 : i32
    %c0_i32_1 = arith.constant 0 : i32
    return %c0_i32, %c0_i32_0 : i32, i32
  }
  func.func @transform_14(%arg0: i32) -> (i32, i32, i32) {
    %c0_i32 = arith.constant 0 : i32
    %c0_i32_0 = arith.constant 0 : i32
    %c0_i32_1 = arith.constant 0 : i32
    return %arg0, %c0_i32, %c0_i32_0 : i32, i32, i32
  }
}

</mosaic_0001>

<bundles_post_ra>
// kernel: encoder_forward.1
= control target key start
LH: loop header
LB: loop body
LE: loop exit
PB: predicated region body
PF: predicated region fallthrough
CT: control target
= control target key end

     0   :  { %s4663_s0 = inlined_call_operand.hbm [shape: f32[2,16,32], index: 0, kind: input, shape index: {}]   ;;  %s4664_s1 = inlined_call_operand.vmem [shape: f32[2,32,96], index: 1, kind: input, shape index: {}]   ;;  %s4665_s2 = inlined_call_operand.vmem [shape: f32[2,1,96], index: 2, kind: input, shape index: {}]   ;;  %s4666_s3 = inlined_call_operand.vmem [shape: f32[2,32,32], index: 3, kind: input, shape index: {}]   ;;  %s4667_s4 = inlined_call_operand.hbm [shape: f32[2,1,32], index: 4, kind: input, shape index: {}]   ;;  %s4668_s5 = inlined_call_operand.vmem [shape: f32[2,32,64], index: 5, kind: input, shape index: {}]   ;;  %s4669_s6 = inlined_call_operand.hbm [shape: f32[2,1,64], index: 6, kind: input, shape index: {}]   ;;  %s4670_s7 = inlined_call_operand.vmem [shape: f32[2,64,32], index: 7, kind: input, shape index: {}]   ;;  %s4671_s8 = inlined_call_operand.hbm [shape: f32[2,1,32], index: 8, kind: input, shape index: {}]   ;;  %s4672_s9 = inlined_call_operand.hbm [shape: f32[2,1,32], index: 9, kind: input, shape index: {}]   ;;  %s4673_s10 = inlined_call_operand.hbm [shape: f32[2,1,32], index: 10, kind: input, shape index: {}]   ;;  %s4674_s11 = inlined_call_operand.hbm [shape: f32[16,16], index: 11, kind: input, shape index: {}]   ;;  %s4675_s12 = inlined_call_operand.vmem [shape: f32[16,16], index: 12, kind: input, shape index: {}]   ;;  %s4676_s13 = inlined_call_operand.vmem [shape: f32[16,16], index: 13, kind: input, shape index: {}]   ;;  %s4677_s14 = inlined_call_operand.hbm [shape: f32[2,16,32], index: 14, kind: output, shape index: {}]  }
   0x1   :  { %4694 = sst [smem:[#allocation20_spill]] %s4663_s0 }
   0x2   :  { %4695 = sst [smem:[#allocation21_spill]] %s4664_s1 }
   0x3   :  { %4696 = sst [smem:[#allocation22_spill]] %s4665_s2 }
   0x4   :  { %4697 = sst [smem:[#allocation23_spill]] %s4666_s3 }
   0x5   :  { %4698 = sst [smem:[#allocation24_spill]] %s4667_s4 }
   0x6   :  { %4699 = sst [smem:[#allocation25_spill]] %s4668_s5 }
   0x7   :  { %4700 = sst [smem:[#allocation26_spill]] %s4670_s7 }
   0x8   :  { %4701 = sst [smem:[#allocation27_spill]] %s4676_s13 }
   0x9   :  { %4702 = sst [smem:[#allocation28_spill]] %s4677_s14 }
   0xa   :  { %19 = vsyncpa [#allocation3], 0 }
   0xb   :  { %21 = vsyncpa [#allocation3 + $0x1], 0 }
   0xc   :  { %22 = vsyncpa [#allocation6], 0 }
   0xd   :  { %23 = vsyncpa [#allocation9], 0 }
   0xe   :  { %24 = vsyncpa [#allocation12], 0 }
   0xf   :  { %25 = vsyncpa [#allocation4], 0 }
  0x10   :  { %27 = vsyncpa [#allocation4 + $0x1], 0  ;;  %s3912_s29 = smov 0   ;;  %s3914_s30 = smov 0  }
  0x11   :  { %s3916_s15 = smov 0   ;;  %s3918_s16 = smov 0  }
  0x12 LB: > { %s3820_s17 = smov [#allocation5]   ;;  %s3933_s19 = sadd.s32 4294967295, %s3818_s16   ;;  %s3818_s16 = sphi %s3918_s16, %s4739_s16   ;;  %s3814_s15 = sphi %s3916_s15, %s4738_s15   ;;  %s3810_s30 = sphi %s3914_s30, %s4737_s30   ;;  %s3806_s29 = sphi %s3912_s29, %s4736_s29  }
  0x13   : > { %s384_s18 = sshll.u32 %s3820_s17, 4  ;;  %p2856_p0 = scmp.ge.s32.totalorder %s3818_s16, 1  ;;  %s3938_s18 = int_to_ptr.vmem [resolvable:$true] %s384_s18 }
  0x14   : > { %p4684_p1 = scmp.eq.s32.totalorder %s3933_s19, 0  ;;  %p363_p2 = scmp.lt.s32.totalorder %s3818_s16, 3 }
  0x15   : > { %s3821_s21 = smov [#allocation8]   ;;  %s3822_s24 = smov [#allocation11]  }
  0x16   : > { %p3940_p3 = pnand %p2856_p0, %p363_p2  ;;  %s416_s22 = sshll.u32 %s3821_s21, 4  ;;  %s3953_s22 = int_to_ptr.vmem [resolvable:$true] %s416_s22 }
  0x17   : > { %s442_s25 = sshll.u32 %s3822_s24, 4  ;;  %s4705_s4 = sld [smem:[#allocation24_spill]]  ;;  %s3955_s25 = int_to_ptr.vmem [resolvable:$true] %s442_s25 }
  0x18   : > { %s4703_s20 = scalar_select %p3940_p3, 1, 0 }
  0x19   : > { %p3410_p5 = pneg %p3940_p3 }
  0x1b   : > { %p3949_p6 = pnand %p3410_p5, %p4684_p1 }
  0x1d   : > { %s3542_s28 = scalar_lea.hbm %s4705_s4, 32  ;;  %p3965_p8 = pneg %p3949_p6 }
  0x1e   : > { %p3543_p7 = scmp.ne.s32.totalorder %s4705_s4, %s3542_s28  ;;  %p3549_p11 = scmp.lt.u32.totalorder %s3542_s28, %s4705_s4 }
  0x20   : > { %p3545_p9 = pnand %p3965_p8, %p3543_p7 }
  0x22   : > { %p3546_p10 = pneg %p3545_p9 }
  0x24   : > { %p3551_p12 = pnand %p3549_p11, %p3546_p10 }
  0x26   : > { %3554 = shalt.err (!%p3551_p12)
}
  0x27   : > { %s3555_s14 = scalar_lea.vmem %s3938_s18, 32  ;;  %p3563_p5 = scmp.lt.s32.totalorder %s3938_s18, %s3938_s18 }
  0x28   : > { %p3556_p13 = scmp.ne.s32.totalorder %s3938_s18, %s3555_s14  ;;  %p3564_p4 = scmp.lt.s32.totalorder %s3555_s14, %s3555_s14 }
  0x2a   : > { %p3558_p0 = pnand %p3556_p13, %p3965_p8  ;;  %p3565_p7 = por %p3564_p4, %p3563_p5 }
  0x2c   : > { %p3559_p2 = pneg %p3558_p0 }
  0x2e   : > { %p3566_p9 = pnand %p3565_p7, %p3559_p2 }
  0x30   : > { %3569 = shalt.err (!%p3566_p9)
}
  0x31   : > { %s3823_s26 = smov 16   ;;  %s3824_s7 = smov 1  }
  0x32   : > { %3413 = dma.hbm_to_vmem [thread:$0]  (!%p3949_p6), %s4705_s4, 32, %s3938_s18, [#allocation6], %s3823_s26, %s3823_s26, %s3824_s7  }
  0x33   : > { %s3570_s14 = scalar_lea.hbm %s4671_s8, 32 }
  0x34   : > { %p3571_p4 = scmp.ne.s32.totalorder %s4671_s8, %s3570_s14  ;;  %p3577_p12 = scmp.lt.u32.totalorder %s3570_s14, %s4671_s8 }
  0x36   : > { %p3573_p10 = pnand %p3571_p4, %p3965_p8 }
  0x38   : > { %p3574_p11 = pneg %p3573_p10 }
  0x3a   : > { %p3579_p13 = pnand %p3577_p12, %p3574_p11 }
  0x3c   : > { %3582 = shalt.err (!%p3579_p13)
}
  0x3d   : > { %s3583_s18 = scalar_lea.vmem %s3953_s22, 32  ;;  %p3591_p7 = scmp.lt.s32.totalorder %s3953_s22, %s3953_s22 }
  0x3e   : > { %p3584_p0 = scmp.ne.s32.totalorder %s3953_s22, %s3583_s18  ;;  %p3592_p9 = scmp.lt.s32.totalorder %s3583_s18, %s3583_s18 }
  0x40   : > { %p3586_p2 = pnand %p3584_p0, %p3965_p8  ;;  %p3593_p4 = por %p3592_p9, %p3591_p7 }
  0x42   : > { %p3587_p5 = pneg %p3586_p2 }
  0x44   : > { %p3594_p10 = pnand %p3593_p4, %p3587_p5 }
  0x46   : > { %3597 = shalt.err (!%p3594_p10)
}
  0x47   : > { %3419 = dma.hbm_to_vmem [thread:$0]  (!%p3949_p6), %s4671_s8, 32, %s3953_s22, [#allocation9], %s3823_s26, %s3823_s26, %s3824_s7  }
  0x48   : > { %s3598_s27 = scalar_lea.hbm %s4673_s10, 32 }
  0x49   : > { %p3599_p11 = scmp.ne.s32.totalorder %s4673_s10, %s3598_s27  ;;  %p3605_p0 = scmp.lt.u32.totalorder %s3598_s27, %s4673_s10 }
  0x4b   : > { %p3601_p12 = pnand %p3599_p11, %p3965_p8 }
  0x4d   : > { %p3602_p13 = pneg %p3601_p12 }
  0x4f   : > { %p3607_p2 = pnand %p3605_p0, %p3602_p13 }
  0x51   : > { %3610 = shalt.err (!%p3607_p2)
}
  0x52   : > { %s3611_s22 = scalar_lea.vmem %s3955_s25, 32  ;;  %p3619_p4 = scmp.lt.s32.totalorder %s3955_s25, %s3955_s25 }
  0x53   : > { %p3612_p5 = scmp.ne.s32.totalorder %s3955_s25, %s3611_s22  ;;  %p3620_p10 = scmp.lt.s32.totalorder %s3611_s22, %s3611_s22 }
  0x55   : > { %p3614_p7 = pnand %p3612_p5, %p3965_p8  ;;  %p3621_p11 = por %p3620_p10, %p3619_p4 }
  0x57   : > { %p3615_p9 = pneg %p3614_p7 }
  0x59   : > { %p3622_p12 = pnand %p3621_p11, %p3615_p9 }
  0x5b   : > { %3625 = shalt.err (!%p3622_p12)
}
  0x5c   : > { %3425 = dma.hbm_to_vmem [thread:$0]  (!%p3949_p6), %s4673_s10, 32, %s3955_s25, [#allocation12], %s3823_s26, %s3823_s26, %s3824_s7  }
  0x5d   : > { %s3825_s3 = smov [#allocation7]   ;;  %s3826_s13 = smov [#allocation10]  }
  0x5e   : > { %s400_s5 = sshll.u32 %s3825_s3, 4  ;;  %s429_s27 = sshll.u32 %s3826_s13, 4  ;;  %s401_s5 = int_to_ptr.vmem [resolvable:$true] %s400_s5  ;;  %s430_s27 = int_to_ptr.vmem [resolvable:$true] %s429_s27 }
  0x5f   : > { %s3626_s24 = scalar_lea.hbm %s4669_s6, 32 }
  0x60   : > { %p3627_p13 = scmp.ne.s32.totalorder %s4669_s6, %s3626_s24  ;;  %p3633_p5 = scmp.lt.u32.totalorder %s3626_s24, %s4669_s6 }
  0x62   : > { %p3629_p0 = pnand %p3627_p13, %p3965_p8 }
  0x64   : > { %p3630_p2 = pneg %p3629_p0 }
  0x66   : > { %p3635_p7 = pnand %p3633_p5, %p3630_p2 }
  0x68   : > { %3638 = shalt.err (!%p3635_p7)
}
  0x69   : > { %s3639_s25 = scalar_lea.vmem %s401_s5, 32  ;;  %p3647_p11 = scmp.lt.s32.totalorder %s401_s5, %s401_s5 }
  0x6a   : > { %p3640_p9 = scmp.ne.s32.totalorder %s401_s5, %s3639_s25  ;;  %p3648_p12 = scmp.lt.s32.totalorder %s3639_s25, %s3639_s25 }
  0x6c   : > { %p3642_p4 = pnand %p3640_p9, %p3965_p8  ;;  %p3649_p1 = por %p3648_p12, %p3647_p11 }
  0x6e   : > { %p3643_p10 = pneg %p3642_p4 }
  0x70   : > { %p3650_p3 = pnand %p3649_p1, %p3643_p10 }
  0x72   : > { %3653 = shalt.err (!%p3650_p3)
}
  0x73   : > { %3416 = dma.hbm_to_vmem [thread:$0]  (!%p3949_p6), %s4669_s6, 32, %s401_s5, [#allocation6], %s3823_s26, %s3823_s26, %s3824_s7  }
  0x74   : > { %s3654_s28 = scalar_lea.hbm %s4672_s9, 32 }
  0x75   : > { %p3655_p1 = scmp.ne.s32.totalorder %s4672_s9, %s3654_s28  ;;  %p3661_p0 = scmp.lt.u32.totalorder %s3654_s28, %s4672_s9 }
  0x77   : > { %p3657_p3 = pnand %p3655_p1, %p3965_p8 }
  0x79   : > { %p3658_p13 = pneg %p3657_p3 }
  0x7b   : > { %p3663_p2 = pnand %p3661_p0, %p3658_p13 }
  0x7d   : > { %3666 = shalt.err (!%p3663_p2)
}
  0x7e   : > { %s3667_s18 = scalar_lea.vmem %s430_s27, 32  ;;  %p3675_p4 = scmp.lt.s32.totalorder %s430_s27, %s430_s27 }
  0x7f   : > { %p3668_p5 = scmp.ne.s32.totalorder %s430_s27, %s3667_s18  ;;  %p3676_p10 = scmp.lt.s32.totalorder %s3667_s18, %s3667_s18 }
  0x81   : > { %p3670_p7 = pnand %p3668_p5, %p3965_p8  ;;  %p3677_p11 = por %p3676_p10, %p3675_p4 }
  0x83   : > { %p3671_p9 = pneg %p3670_p7 }
  0x85   : > { %p3678_p12 = pnand %p3677_p11, %p3671_p9 }
  0x87   : > { %3681 = shalt.err (!%p3678_p12)
}
  0x88   : > { %3422 = dma.hbm_to_vmem [thread:$0]  (!%p3949_p6), %s4672_s9, 32, %s430_s27, [#allocation9], %s3823_s26, %s3823_s26, %s3824_s7  }
  0x89   : > { %s3827_s4 = smov [#allocation13]   ;;  %s3682_s28 = scalar_lea.hbm %s4674_s11, 256 }
  0x8a   : > { %s455_s2 = sshll.u32 %s3827_s4, 4  ;;  %p3683_p1 = scmp.ne.s32.totalorder %s4674_s11, %s3682_s28  ;;  %s456_s2 = int_to_ptr.vmem [resolvable:$true] %s455_s2 }
  0x8b   : > { %p3689_p0 = scmp.lt.u32.totalorder %s3682_s28, %s4674_s11 }
  0x8c   : > { %p3685_p3 = pnand %p3683_p1, %p3965_p8 }
  0x8e   : > { %p3686_p13 = pneg %p3685_p3 }
  0x90   : > { %p3691_p2 = pnand %p3689_p0, %p3686_p13 }
  0x92   : > { %3694 = shalt.err (!%p3691_p2)
}
  0x93   : > { %s3695_s26 = scalar_lea.vmem %s456_s2, 256  ;;  %p3703_p4 = scmp.lt.s32.totalorder %s456_s2, %s456_s2 }
  0x94   : > { %p3696_p5 = scmp.ne.s32.totalorder %s456_s2, %s3695_s26  ;;  %p3704_p10 = scmp.lt.s32.totalorder %s3695_s26, %s3695_s26 }
  0x96   : > { %p3698_p7 = pnand %p3696_p5, %p3965_p8  ;;  %p3705_p11 = por %p3704_p10, %p3703_p4 }
  0x98   : > { %p3699_p9 = pneg %p3698_p7 }
  0x9a   : > { %p3706_p12 = pnand %p3705_p11, %p3699_p9 }
  0x9c   : > { %3709 = shalt.err (!%p3706_p12)
}
  0x9d   : > { %s4686_s7 = smov 128   ;;  %s3829_s21 = smov 8  }
  0x9e   : > { %3428 = dma.hbm_to_vmem [thread:$0]  (!%p3949_p6), %s4674_s11, 256, %s456_s2, [#allocation12], %s4686_s7, %s4686_s7, %s3829_s21  }
  0x9f   : > { %s2855_s5 = sadd.s32 4294967294, %s3818_s16   ;;  %s4106_s25 = sadd.s32 1, %s3818_s16  }
  0xa0   : > { %s37_s4 = ssub.s32 %s3818_s16, %s4106_s25  ;;  %s40_s3 = sadd.s32 1, %s3814_s15 }
  0xa1   : > { %p38_p8 = scmp.eq.s32.totalorder %s37_s4, 0  ;;  %p47_p1 = scmp.ne.s32.totalorder %s3814_s15, %s3810_s30 }
  0xa2   : > { %p48_p3 = scmp.eq.s32.totalorder %s3818_s16, 0  ;;  %p53_p13 = scmp.ne.s32.totalorder %s3810_s30, %s3806_s29 }
  0xa3   : > { %s4117_s23 = scalar_select %p38_p8, %s3814_s15, %s40_s3  }
  0xa4   : > { %p4119_p0 = por %p48_p3, %p47_p1  ;;  %p4708_p2 = scmp.eq.s32.totalorder %s3933_s19, 0 }
  0xa5   : > { %p350_p5 = scmp.eq.s32.totalorder %s3933_s19, 1  ;;  %p356_p7 = scmp.eq.s32.totalorder %s2855_s5, 1 }
  0xa6   : > { %p4125_p6 = por %p4708_p2, %p53_p13  ;;  %p3443_p9 = scmp.lt.s32.totalorder %s3818_s16, 2 }
  0xa7   : > { %s475_s28 = sand.u32 1, %s3814_s15   ;;  %p4132_p4 = por %p350_p5, %p47_p1 }
  0xa8   : > { %p4136_p10 = por %p356_p7, %p53_p13  ;;  %s2864_s14 = sshll.u32 %s475_s28, 4 }
  0xa9   : > { %s4710_s17 = scalar_select %p4132_p4, 1, 0 }
  0xaa   : > { %s4711_s24 = scalar_select %p4136_p10, 1, 0 }
  0xab   : > { %s2960_s22 = sshll.u32 %s3818_s16, 8  ;;  %s4712_s0 = sld [smem:[#allocation20_spill]] }
  0xac   : > { %s479_s5 = scalar_lea.vmem [#allocation2], %s2864_s14  ;;  %p4150_p11 = pnand %p3443_p9, %p4119_p0 }
  0xad   : > { %s486_s4 = sshll.u32 %s479_s5, 4  ;;  %s4154_s7 = scalar_lea.sflag [#allocation3], %s475_s28  ;;  %s4146_s4 = int_to_ptr.vmem [resolvable:$true] %s486_s4 }
  0xae   : > { %p3712_p8 = pneg %p4150_p11 }
  0xb1   : > { %s4144_s18 = scalar_lea.hbm %s4712_s0, %s2960_s22  ;;  %s3715_s13 = scalar_lea.hbm %s4712_s0, 512 }
  0xb2   : > { %s3710_s26 = scalar_lea.hbm %s4144_s18, 256  ;;  %p3716_p13 = scmp.lt.u32.totalorder %s4144_s18, %s4712_s0 }
  0xb3   : > { %p3711_p12 = scmp.ne.s32.totalorder %s4144_s18, %s3710_s26  ;;  %p3717_p0 = scmp.lt.u32.totalorder %s3715_s13, %s3710_s26 }
  0xb4   : > { %p3719_p5 = scmp.lt.u32.totalorder %s3710_s26, %s4144_s18 }
  0xb5   : > { %p3713_p1 = pnand %p3712_p8, %p3711_p12  ;;  %p3718_p2 = por %p3717_p0, %p3716_p13 }
  0xb7   : > { %p3714_p3 = pneg %p3713_p1  ;;  %p3720_p7 = por %p3719_p5, %p3718_p2 }
  0xb9   : > { %p3721_p9 = pnand %p3720_p7, %p3714_p3 }
  0xbb   : > { %3724 = shalt.err (!%p3721_p9)
}
  0xbc   : > { %s3725_s28 = scalar_lea.vmem %s4146_s4, 256  ;;  %s3830_s14 = smov [#allocation2]  }
  0xbd   : > { %p3726_p12 = scmp.ne.s32.totalorder %s4146_s4, %s3725_s28  ;;  %s3730_s22 = sshll.u32 %s3830_s14, 4  ;;  %s3731_s22 = int_to_ptr.vmem [resolvable:$false] %s3730_s22 }
  0xbe   : > { %s3732_s27 = scalar_lea.vmem %s3731_s22, 512  ;;  %p3733_p4 = scmp.lt.s32.totalorder %s4146_s4, %s3731_s22 }
  0xbf   : > { %p3728_p1 = pnand %p3726_p12, %p3712_p8  ;;  %p3734_p13 = scmp.lt.s32.totalorder %s3732_s27, %s3725_s28 }
  0xc1   : > { %p3729_p10 = pneg %p3728_p1  ;;  %p3735_p0 = por %p3734_p13, %p3733_p4 }
  0xc3   : > { %p3736_p2 = pnand %p3735_p0, %p3729_p10 }
  0xc5   : > { %3739 = shalt.err (!%p3736_p2)
}
  0xc6   : > { %s4714_s26 = smov 128   ;;  %p4715_p8 = scmp.ne.s32.totalorder %s4703_s20, 0 }
  0xc7   : > { %3432 = dma.hbm_to_vmem [thread:$0]  (!%p4150_p11), %s4144_s18, 256, %s4146_s4, %s4154_s7, %s4714_s26, %s4714_s26, %s3829_s21  }
  0xc8   : > { %498 = sbr.rel (%p4715_p8) target bundleno = 6548 (0x1994), region = 76  ;;  %s4188_s13 = sand.u32 (!%p4715_p8), 1, %s3810_s30  }
  0xc9   : > { %s4688_s5 = sshll.u32 (!%p4715_p8), %s4188_s13, 4  ;;  %s501_s28 = scalar_lea.sflag (!%p4715_p8), [#allocation3], %s4188_s13 }
  0xca   : > { %s504_s3 = scalar_lea.vmem (!%p4715_p8), [#allocation2], %s4688_s5 }
  0xcf   : > { %3785 = dma.done.wait (%p4125_p6), %s501_s28, 256  }
  0xd0   : > { %3787 = vsyncadd (%p4125_p6), %s501_s28, 4294967040  ;;  %p4716_p4 = scmp.eq.s32.totalorder %s3933_s19, 0 }
  0xd2   : > { %3789 = dma.done.wait (%p4716_p4), [#allocation6], 64   ;;  %p4717_p10 = pmov %p4716_p4 }
  0xd3   : > { %p4718_p11 = pmov %p4716_p4 }
  0xd4   : > { %3791 = vsyncadd (%p4717_p10), [#allocation6], 4294967232 }
  0xd5   : > { %3793 = dma.done.wait (%p4718_p11), [#allocation9], 64   ;;  %p4719_p3 = pmov %p4716_p4 }
  0xd7   : > { %3795 = vsyncadd (%p4719_p3), [#allocation9], 4294967232  ;;  %p4720_p5 = pmov %p4719_p3 }
  0xd8   : > { %p4721_p7 = pmov %p4719_p3 }
  0xd9   : > { %3797 = dma.done.wait (%p4720_p5), [#allocation12], 288  }
  0xda   : > { %3799 = vsyncadd (%p4721_p7), [#allocation12], 4294967008  ;;  %vm603_vm0 = vcmask 261120   ;;  %s4722_s1 = sld [smem:[#allocation21_spill]]  ;;  %v4222_v5 = vld [vmem:[%s504_s3] sm:$0xff]  ;;  %v4226_v7 = vld [vmem:[%s504_s3 + $0x8] sm:$0xff]  ;;  %v581_v55 = vlaneseq }
  0xdb   : > { %3074 = vmatprep.mubr.msk.f32.mxu0 %vm603_vm0, %v4222_v5  ;;  %v4233_v8 = vld [vmem:[%s4675_s12] sm:$0xff]  ;;  %vm685_vm1 = vcmask 130048   ;;  %s4723_s7 = sld [smem:[#allocation22_spill]]  ;;  %v4243_v15 = vld [vmem:[%s4675_s12 + $0x8] sm:$0xff]  ;;  %s4724_s4 = sld [smem:[#allocation27_spill]]  ;;  %vm1441_vm15 = vcmask 523264  }
  0xdc   : > { %3081 = vmatprep.mubr.msk.f32.mxu1 %vm685_vm1, %v4233_v8  ;;  %s4691_s27 = smov 96   ;;  %v4297_v60 = vshrl.u32 %v581_v55, 7  ;;  %s4689_s26 = smov 64  }
  0xdd   : > { %s4725_s3 = sld [smem:[#allocation23_spill]]  ;;  %s4726_s20 = sld [smem:[#allocation25_spill]] }
  0xde   : > { %v4300_v63 = vadd.s32 8, %v4297_v60  ;;  %s4727_s28 = sld [smem:[#allocation26_spill]]  ;;  %s4728_s21 = smov 96  }
  0xdf   : > { %s4729_s2 = smov 64   ;;  %s2961_s18 = sshll.u32 %s3933_s19, 8 }
  0xe0   : > { %v592_v0 = vld [vmem:[%s4722_s1] sm:$0xff]  ;;  %v593_v1 = vld [vmem:[%s4722_s1 + $0x8] sm:$0xff]  ;;  %v594_v2 = vld [vmem:[%s4722_s1 + $0x10] sm:$0xff]  ;;  %s4730_s14 = sshll.u32 %s4188_s13, 4  ;;  %p4732_p9 = scmp.ne.s32.totalorder %s4710_s17, 0 }
  0xe1   : > { %v3254_v3 = vpack.c.bf16 %v593_v1, %v592_v0  ;;  %v595_v4 = vld [vmem:[%s4722_s1 + $0x18] sm:$0xff]  ;;  %v2878_v9 = vld [vmem:[%s4723_s7] ss:$0 sm:$0xff]  ;;  %v4257_v17 = vld [vmem:[%s4724_s4 + $0x8] sm:$0xff]  ;;  %v4302_v0 = vand.u32 127, %v581_v55 }
  0xe2   : > { %v3258_v6 = vpack.c.bf16 %v595_v4, %v594_v2  ;;  %v4248_v16 = vld [vmem:[%s4724_s4] sm:$0xff]  ;;  %v3832_v4 = vmov 0.0  }
  0xe3   : > { %3255 = vmatprep.subr.bf16.mxu0 %v3254_v3  ;;  %vm587_vm2 = vcmp.eq.s32.totalorder %v4300_v63, %v4302_v0  ;;  %vm586_vm3 = vcmp.eq.s32.totalorder %v4297_v60, %v4302_v0  ;;  %vm920_vm4 = vcmp.lt.s32.totalorder %v4300_v63, %v4302_v0  ;;  %vm919_vm7 = vcmp.lt.s32.totalorder %v4297_v60, %v4302_v0 }
  0xe4   : > { %3257 = vmatpush3.bf16.msra.mxu0 %v3254_v3 }
  0xe5   : > { %3259 = vmatprep.subr.bf16.mxu0 %v3258_v6 }
  0xe8   : > { %3261 = vmatpush3.bf16.msra.mxu0 %v3258_v6  ;;  %v4309_v6 = vsel %vm587_vm2, 1.0, %v3832_v4 }
  0xeb   : > { %3075 = vmatmul.mubr.msk.f32.vlgmr.msra.gmra.mrb[0].mxu0 %vm603_vm0, %v4226_v7 }
 0x1be   : > { %v3076_v10 = vpop.f32.mrb[0].mxu0 }
 0x1bf   : > { %v682_v11 = vadd.f32 %v3076_v10, %v2878_v9  ;;  %v676_v12 = vpop.f32.mrb[1].mxu0 }
 0x1c0   : > { %v677_v13 = vadd.f32 %v2878_v9, %v676_v12  ;;  %v4312_v9 = vsel %vm586_vm3, 1.0, %v3832_v4 }
 0x1c2   : > { %v3262_v14 = vpack.c.bf16 %v682_v11, %v677_v13 }
 0x1c4   : > { %3263 = vmatprep.subr.bf16.mxu1 %v3262_v14 }
 0x1c5   : > { %3265 = vmatpush3.bf16.msra.mxu1 %v3262_v14 }
 0x1c6   : > { %3267 = vmatprep.subr.bf16.mxu1 %v3262_v14 }
 0x1c8   : > { %3082 = vmatmul.mubr.msk.f32.vlgmr.msra.gmra.mrb[0].mxu1 %vm685_vm1, %v4243_v15 }
 0x1c9   : > { %3269 = vmatpush3.bf16.msra.mxu1 %v3262_v14  ;;  %3088 = vmatprep.mubr.msk.f32.mxu1 %vm685_vm1, %v4248_v16 }
 0x1cc   : > { %3089 = vmatmul.mubr.msk.f32.vlgmr.msra.gmra.mrb[2].mxu1 %vm685_vm1, %v4257_v17 }
 0x1cd   : > { %3095 = vmatprep.mubr.msk.f32.mxu1 %vm685_vm1, %v4233_v8 }
 0x29b   : > { %v4263_v18 = vpop.f32.mrb[0].mxu1 }
 0x29c   : > { %v4265_v19 = vpop.f32.mrb[1].mxu1 }
 0x29d   : > { %850 = vrot.lane.b32.xlu0 %v4265_v19, %s4691_s27 }
 0x29f   : > { %v4269_v20 = vpop.f32.mrb[2].mxu1 }
 0x2a0   : > { %v4271_v21 = vpop.f32.mrb[3].mxu1 }
 0x2a1   : > { %852 = vrot.lane.b32.xlu0 %v4263_v18, %s4691_s27  ;;  %860 = vrot.lane.b32.xlu1 %v4271_v21, %s4691_s27 }
 0x2a5   : > { %862 = vrot.lane.b32.xlu1 %v4269_v20, %s4691_s27  ;;  %s572_s27 = scalar_lea.vmem [#allocation14], %s4730_s14 }
 0x2a6   : > { %s2725_s22 = sshll.u32 %s572_s27, 4  ;;  %s4617_s22 = int_to_ptr.vmem [resolvable:$true] %s2725_s22 }
 0x2a7   : > { %s3740_s14 = scalar_lea.vmem %s4617_s22, 256 }
 0x2a8   : > { %p3741_p6 = scmp.ne.s32.totalorder %s4617_s22, %s3740_s14 }
 0x2aa   : > { %p3742_p12 = pnand %p3741_p6, %p4732_p9 }
 0x2ac   : > { %p3743_p1 = pneg %p3742_p12 }
 0x30f   : > { %v851_v22 = vpop.permute.xlu0 %850 }
 0x310   : > { %v856_v24 = vmul.f32 %v851_v22, %v4265_v19  ;;  %v880_v25 = vmul.f32 %v851_v22, %v4271_v21 }
 0x313   : > { %v861_v23 = vpop.permute.xlu1 %860  ;;  %v853_v26 = vpop.permute.xlu0 %852 }
 0x314   : > { %v866_v27 = vmul.f32 %v861_v23, %v4271_v21  ;;  %v878_v28 = vmul.f32 %v861_v23, %v4265_v19  ;;  %v857_v31 = vmul.f32 %v4263_v18, %v853_v26  ;;  %v881_v33 = vmul.f32 %v4269_v20, %v853_v26 }
 0x316   : > { %v868_v29 = vadd.f32 %v866_v27, %v856_v24  ;;  %v882_v30 = vsub.f32 %v878_v28, %v880_v25 }
 0x317   : > { %v863_v32 = vpop.permute.xlu1 %862 }
 0x318   : > { %v867_v34 = vmul.f32 %v4269_v20, %v863_v32  ;;  %v879_v35 = vmul.f32 %v4263_v18, %v863_v32  ;;  %v870_v36 = vsel %vm603_vm0, %v868_v29, 0.0  ;;  %v884_v40 = vsel %vm603_vm0, %v882_v30, 0.0 }
 0x319   : > { %871 = vadd.xlane.f32.xlu0 %v870_v36 }
 0x31a   : > { %v869_v37 = vadd.f32 %v867_v34, %v857_v31  ;;  %v883_v38 = vsub.f32 %v879_v35, %v881_v33 }
 0x31c   : > { %v873_v39 = vsel %vm603_vm0, %v869_v37, 0.0  ;;  %v887_v41 = vsel %vm603_vm0, %v883_v38, 0.0 }
 0x31d   : > { %874 = vadd.xlane.f32.xlu1 %v873_v39  ;;  %885 = vadd.xlane.f32.xlu0 %v884_v40 }
 0x321   : > { %888 = vadd.xlane.f32.xlu0 %v887_v41 }
 0x3a6   : > { %v872_v42 = vpop.xlane.xlu0 %871 }
 0x3a7   : > { %v876_v45 = vmul.f32 0.001953125, %v872_v42 }
 0x3a9   : > { %v892_v50 = vmul.f32 %v876_v45, %v4233_v8 }
 0x3aa   : > { %v875_v43 = vpop.xlane.xlu1 %874  ;;  %v886_v44 = vpop.xlane.xlu0 %885 }
 0x3ab   : > { %v890_v46 = vmul.f32 0.001953125, %v886_v44  ;;  %v877_v47 = vmul.f32 0.001953125, %v875_v43 }
 0x3ad   : > { %v894_v48 = vmul.f32 %v890_v46, %v4248_v16  ;;  %v893_v52 = vmul.f32 %v877_v47, %v4243_v15 }
 0x3ae   : > { %v889_v49 = vpop.xlane.xlu0 %888 }
 0x3af   : > { %v891_v51 = vmul.f32 0.001953125, %v889_v49  ;;  %v896_v53 = vsub.f32 %v892_v50, %v894_v48 }
 0x3b1   : > { %v895_v54 = vmul.f32 %v891_v51, %v4257_v17  ;;  %v898_v57 = vsel %vm685_vm1, %v896_v53, 0.0 }
 0x3b3   : > { %v897_v56 = vsub.f32 %v893_v52, %v895_v54 }
 0x3b5   : > { %v899_v58 = vsel %vm685_vm1, %v897_v56, 0.0 }
 0x3b6   : > { %v900_v59 = vadd.f32 %v899_v58, %v898_v57 }
 0x3b8   : > { %v901_v61 = vrot.slane %v900_v59, 4 }
 0x3ba   : > { %v902_v62 = vadd.f32 %v901_v61, %v900_v59 }
 0x3bc   : > { %v903_v1 = vrot.slane %v902_v62, 2 }
 0x3be   : > { %v904_v2 = vadd.f32 %v903_v1, %v902_v62 }
 0x3c0   : > { %v905_v3 = vrot.slane %v904_v2, 1 }
 0x3c2   : > { %v906_v10 = vadd.f32 %v905_v3, %v904_v2 }
 0x3c4   : > { %v908_v11 = vmul.f32 %v4309_v6, %v906_v10  ;;  %v907_v12 = vmul.f32 %v4312_v9, %v906_v10 }
 0x3c6   : > { %v912_v13 = vsel %vm685_vm1, %v908_v11, 0.0  ;;  %v909_v14 = vsel %vm685_vm1, %v907_v12, 0.0 }
 0x3c7   : > { %913 = vadd.xlane.f32.xlu0 %v912_v13  ;;  %910 = vadd.xlane.f32.xlu1 %v909_v14 }
 0x454   : > { %v914_v22 = vpop.xlane.xlu0 %913  ;;  %v911_v23 = vpop.xlane.xlu1 %910 }
 0x455   : > { %vm916_vm5 = vcmp.gt.f32.partialorder %v914_v22, %v906_v10  ;;  %vm918_vm6 = vcmp.eq.f32.partialorder %v914_v22, %v906_v10  ;;  %vm917_vm8 = vcmp.eq.f32.partialorder %v911_v23, %v906_v10  ;;  %vm915_vm10 = vcmp.gt.f32.partialorder %v911_v23, %v906_v10 }
 0x456   : > { %vm922_vm9 = vmand %vm918_vm6, %vm920_vm4 }
 0x457   : > { %vm924_vm11 = vmor %vm916_vm5, %vm922_vm9 }
 0x458   : > { %v2886_v24 = vsel %vm924_vm11, 1.0, %v3832_v4  ;;  %vm921_vm12 = vmand %vm917_vm8, %vm919_vm7 }
 0x459   : > { %v930_v25 = vsel %vm685_vm1, %v2886_v24, 0.0  ;;  %vm923_vm13 = vmor %vm915_vm10, %vm921_vm12 }
 0x45a   : > { %v2885_v26 = vsel %vm923_vm13, 1.0, %v3832_v4 }
 0x45b   : > { %v929_v27 = vsel %vm685_vm1, %v2885_v26, 0.0 }
 0x45c   : > { %v931_v28 = vadd.f32 %v930_v25, %v929_v27 }
 0x45e   : > { %v932_v29 = vrot.slane %v931_v28, 4 }
 0x460   : > { %v933_v30 = vadd.f32 %v932_v29, %v931_v28 }
 0x462   : > { %v934_v31 = vrot.slane %v933_v30, 2 }
 0x464   : > { %v935_v32 = vadd.f32 %v934_v31, %v933_v30  ;;  %v1150_v30 = vld [vmem:[%s4725_s3 + $0x8] sm:$0xff] }
 0x466   : > { %v936_v33 = vrot.slane %v935_v32, 1 }
 0x468   : > { %v937_v34 = vadd.f32 %v936_v33, %v935_v32  ;;  %v1151_v32 = vld [vmem:[%s4725_s3 + $0x10] sm:$0xff]  ;;  %v1152_v33 = vld [vmem:[%s4725_s3 + $0x18] sm:$0xff] }
 0x46a   : > { %vm938_vm14 = vcmp.lt.f32.partialorder %v937_v34, 2.0  ;;  %v3282_v34 = vpack.c.bf16 %v1152_v33, %v1151_v32  ;;  %v2899_v32 = vld [vmem:[#allocation8] ss:$0 sm:$0xff] }
 0x46b   : > { %v939_v35 = vsel %vm938_vm14, %v906_v10, -inf }
 0x46c   : > { %v940_v36 = vsel %vm685_vm1, %v939_v35, -inf }
 0x46d   : > { %941 = vmax.xlane.f32.xlu1 %v940_v36 }
 0x4fa   : > { %v942_v37 = vpop.xlane.xlu1 %941 }
 0x4fb   : > { %v943_v38 = vsub.f32 %v906_v10, %v942_v37 }
 0x4fd   : > { %v944_v39 = vmul.f32 1.442695, %v943_v38 }
 0x4ff   : > { %3518 = vpow2.f32 %v944_v39 }
 0x509   : > { %v3519_v40 = vpop.eup %3518 }
 0x50a   : > { %v946_v41 = vsel %vm938_vm14, %v3519_v40, 0.0 }
 0x50b   : > { %v947_v42 = vsel %vm685_vm1, %v946_v41, 0.0 }
 0x50c   : > { %948 = vadd.xlane.f32.xlu0 %v947_v42  ;;  %v2891_v42 = vld [vmem:[#allocation5] ss:$0 sm:$0xff] }
 0x599   : > { %v949_v43 = vpop.xlane.xlu0 %948 }
 0x59a   : > { %3520 = vrcp.f32 %v949_v43 }
 0x5a4   : > { %v3521_v44 = vpop.eup %3520 }
 0x5a5   : > { %v951_v45 = vmul.f32 %v3521_v44, %v946_v41  ;;  %v4372_v41 = vld [vmem:[#allocation13] sm:$0xff] }
 0x5a7   : > { %v952_v46 = vmul.f32 0.0625, %v951_v45 }
 0x5a9   : > { %v954_v47 = vmul.f32 %v952_v46, %v4243_v15  ;;  %v953_v48 = vmul.f32 %v952_v46, %v4233_v8  ;;  %v962_v51 = vmul.f32 %v952_v46, %v4257_v17  ;;  %v961_v52 = vmul.f32 %v952_v46, %v4248_v16 }
 0x5ab   : > { %v958_v49 = vsel %vm685_vm1, %v954_v47, 0.0  ;;  %v955_v50 = vsel %vm685_vm1, %v953_v48, 0.0  ;;  %v966_v53 = vsel %vm685_vm1, %v962_v51, 0.0  ;;  %v963_v54 = vsel %vm685_vm1, %v961_v52, 0.0  ;;  %v1324_v48 = vld [vmem:[%s4726_s20] sm:$0xff] }
 0x5ac   : > { %959 = vadd.xlane.f32.xlu0 %v958_v49  ;;  %956 = vadd.xlane.f32.xlu1 %v955_v50  ;;  %v1325_v49 = vld [vmem:[%s4726_s20 + $0x8] sm:$0xff] }
 0x5ad   : > { %v3290_v52 = vpack.c.bf16 %v1325_v49, %v1324_v48 }
 0x5b0   : > { %967 = vadd.xlane.f32.xlu0 %v966_v53  ;;  %964 = vadd.xlane.f32.xlu1 %v963_v54  ;;  %v1326_v53 = vld [vmem:[%s4726_s20 + $0x10] sm:$0xff] }
 0x5b1   : > { %v4390_v54 = vld [vmem:[#allocation13 + $0x8] sm:$0xff] }
 0x639   : > { %v960_v55 = vpop.xlane.xlu0 %959  ;;  %v957_v56 = vpop.xlane.xlu1 %956 }
 0x63a   : > { %v970_v57 = vmul.f32 %v4263_v18, %v960_v55  ;;  %v978_v58 = vmul.f32 %v4269_v20, %v960_v55  ;;  %v969_v59 = vmul.f32 %v957_v56, %v4265_v19  ;;  %v977_v61 = vmul.f32 %v957_v56, %v4271_v21 }
 0x63d   : > { %v968_v62 = vpop.xlane.xlu0 %967  ;;  %v965_v1 = vpop.xlane.xlu1 %964 }
 0x63e   : > { %v972_v2 = vmul.f32 %v4269_v20, %v968_v62  ;;  %v976_v3 = vmul.f32 %v4263_v18, %v968_v62  ;;  %v971_v10 = vmul.f32 %v965_v1, %v4271_v21  ;;  %v975_v11 = vmul.f32 %v965_v1, %v4265_v19  ;;  %v1149_v19 = vld [vmem:[%s4725_s3] sm:$0xff]  ;;  %v1429_v62 = vld [vmem:[%s4727_s28 + $0x18] sm:$0xff] }
 0x63f   : > { %v3278_v31 = vpack.c.bf16 %v1150_v30, %v1149_v19 }
 0x640   : > { %v974_v12 = vadd.f32 %v972_v2, %v970_v57  ;;  %v980_v13 = vsub.f32 %v976_v3, %v978_v58  ;;  %v973_v14 = vadd.f32 %v971_v10, %v969_v59  ;;  %v979_v22 = vsub.f32 %v975_v11, %v977_v61  ;;  %v1426_v57 = vld [vmem:[%s4727_s28] sm:$0xff]  ;;  %v1427_v58 = vld [vmem:[%s4727_s28 + $0x8] sm:$0xff]  ;;  %v1428_v61 = vld [vmem:[%s4727_s28 + $0x10] sm:$0xff] }
 0x641   : > { %3279 = vmatprep.subr.bf16.mxu0 %v3278_v31  ;;  %v3298_v59 = vpack.c.bf16 %v1427_v58, %v1426_v57  ;;  %v3302_v1 = vpack.c.bf16 %v1429_v62, %v1428_v61  ;;  %v1430_v2 = vld [vmem:[%s4727_s28 + $0x20] sm:$0xff]  ;;  %v1431_v3 = vld [vmem:[%s4727_s28 + $0x28] sm:$0xff]  ;;  %v1432_v11 = vld [vmem:[%s4727_s28 + $0x30] sm:$0xff] }
 0x642   : > { %v3503_v23 = vpack.i.bf16 %v980_v13, %v979_v22  ;;  %v3498_v24 = vpack.i.bf16 %v974_v12, %v973_v14  ;;  %3281 = vmatpush3.bf16.msra.mxu0 %v3278_v31  ;;  %v3306_v10 = vpack.c.bf16 %v1431_v3, %v1430_v2  ;;  %v1433_v12 = vld [vmem:[%s4727_s28 + $0x38] sm:$0xff]  ;;  %v2896_v14 = vld [vmem:[#allocation7] ss:$0 sm:$0xff] }
 0x643   : > { %3283 = vmatprep.subr.bf16.mxu0 %v3282_v34  ;;  %v3310_v13 = vpack.c.bf16 %v1433_v12, %v1432_v11  ;;  %v2909_v58 = vld [vmem:[%s4722_s1 + $0x38] sm:$0xff]  ;;  %v2904_v12 = vld [vmem:[#allocation10] ss:$0 sm:$0xff] }
 0x644   : > { %3504 = vrot.lane.b32.xlu0 %v3503_v23, %s4689_s26  ;;  %3499 = vrot.lane.b32.xlu1 %v3498_v24, %s4689_s26  ;;  %s3834_s26 = smov [#allocation14]  }
 0x646   : > { %3285 = vmatpush3.bf16.msra.mxu0 %v3282_v34 }
 0x647   : > { %3299 = vmatprep.subr.bf16.mxu0 %v3298_v59 }
 0x6b6   : > { %v3505_v25 = vpop.permute.xlu0 %3504  ;;  %v3500_v26 = vpop.permute.xlu1 %3499 }
 0x6b7   : > { %v3507_v20 = vunpack.i.h.bf16 %v3505_v25  ;;  %v3506_v27 = vunpack.i.l.bf16 %v3505_v25  ;;  %v3502_v18 = vunpack.i.h.bf16 %v3500_v26  ;;  %v3501_v28 = vunpack.i.l.bf16 %v3500_v26 }
 0x6b9   : > { %v3270_v21 = vpack.c.bf16 %v3502_v18, %v3501_v28  ;;  %v3274_v29 = vpack.c.bf16 %v3507_v20, %v3506_v27 }
 0x6bb   : > { %3271 = vmatprep.subr.bf16.mxu1 %v3270_v21 }
 0x6bc   : > { %3273 = vmatpush3.bf16.msra.mxu1 %v3270_v21 }
 0x6bd   : > { %3275 = vmatprep.subr.bf16.mxu1 %v3274_v29 }
 0x6bf   : > { %3096 = vmatmul.mubr.msk.f32.vlgmr.msra.gmra.mrb[4].mxu1 %vm685_vm1, %v4243_v15 }
 0x6c0   : > { %3277 = vmatpush3.bf16.msra.mxu1 %v3274_v29  ;;  %3102 = vmatprep.mubr.msk.f32.mxu1 %vm685_vm1, %v4248_v16 }
 0x6c3   : > { %3103 = vmatmul.mubr.msk.f32.vlgmr.msra.gmra.mrb[6].mxu1 %vm685_vm1, %v4257_v17 }
 0x6c4   : > { %3120 = vmatprep.mubr.msk.f32.mxu1 %vm685_vm1, %v4372_v41 }
 0x792   : > { %v3097_v35 = vpop.f32.mrb[4].mxu1 }
 0x793   : > { %v1055_v36 = vpop.f32.mrb[5].mxu1 }
 0x796   : > { %v3104_v37 = vpop.f32.mrb[6].mxu1 }
 0x797   : > { %v1148_v38 = vsub.f32 %v3097_v35, %v3104_v37  ;;  %v1138_v39 = vpop.f32.mrb[7].mxu1 }
 0x798   : > { %v1147_v40 = vsub.f32 %v1055_v36, %v1138_v39 }
 0x79a   : > { %3113 = vmatprep.mubr.msk.f32.mxu0 %vm603_vm0, %v1147_v40 }
 0x79b   : > { %3114 = vmatmul.mubr.msk.f32.vlgmr.msra.gmra.mrb[2].mxu0 %vm603_vm0, %v1148_v38 }
 0x79c   : > { %3301 = vmatpush3.bf16.msra.mxu0 %v3298_v59 }
 0x79d   : > { %3303 = vmatprep.subr.bf16.mxu0 %v3302_v1 }
 0x7a0   : > { %3305 = vmatpush3.bf16.msra.mxu0 %v3302_v1 }
 0x7a1   : > { %3307 = vmatprep.subr.bf16.mxu0 %v3306_v10 }
 0x7a4   : > { %3309 = vmatpush3.bf16.msra.mxu0 %v3306_v10 }
 0x7a5   : > { %3311 = vmatprep.subr.bf16.mxu0 %v3310_v13 }
 0x7a8   : > { %3313 = vmatpush3.bf16.msra.mxu0 %v3310_v13 }
 0x86e   : > { %v3115_v43 = vpop.f32.mrb[2].mxu0 }
 0x86f   : > { %v1238_v44 = vadd.f32 %v3115_v43, %v2891_v42  ;;  %v1232_v45 = vpop.f32.mrb[3].mxu0 }
 0x870   : > { %v1233_v46 = vadd.f32 %v2891_v42, %v1232_v45 }
 0x871   : > { %v1242_v47 = vadd.f32 %v1238_v44, %v4226_v7  ;;  %v1327_v7 = vld [vmem:[%s4726_s20 + $0x18] sm:$0xff] }
 0x872   : > { %v1241_v50 = vadd.f32 %v1233_v46, %v4222_v5  ;;  %v3294_v55 = vpack.c.bf16 %v1327_v7, %v1326_v53 }
 0x874   : > { %v3286_v51 = vpack.c.bf16 %v1242_v47, %v1241_v50 }
 0x876   : > { %3287 = vmatprep.subr.bf16.mxu1 %v3286_v51 }
 0x877   : > { %3289 = vmatpush3.bf16.msra.mxu1 %v3286_v51 }
 0x878   : > { %3291 = vmatprep.subr.bf16.mxu1 %v3290_v52 }
 0x87a   : > { %3121 = vmatmul.mubr.msk.f32.vlgmr.msra.gmra.mrb[8].mxu1 %vm685_vm1, %v4390_v54 }
 0x87b   : > { %3293 = vmatpush3.bf16.msra.mxu1 %v3290_v52 }
 0x87c   : > { %3295 = vmatprep.subr.bf16.mxu1 %v3294_v55 }
 0x87f   : > { %3297 = vmatpush3.bf16.msra.mxu1 %v3294_v55  ;;  %v2906_v55 = vld [vmem:[%s4722_s1 + $0x20] sm:$0xff] }
 0x94d   : > { %v3122_v5 = vpop.f32.mrb[8].mxu1 }
 0x94e   : > { %v1315_v56 = vpop.f32.mrb[9].mxu1 }
 0x94f   : > { %3131 = vmatprep.mubr.msk.f32.mxu1 %vm603_vm0, %v1315_v56 }
 0x950   : > { %3132 = vmatmul.mubr.msk.f32.vlgmr.msra.gmra.mrb[10].mxu1 %vm603_vm0, %v3122_v5 }
 0x951   : > { %3157 = vmatprep.mubr.msk.f32.mxu1 %vm685_vm1, %v4372_v41 }
 0xa23   : > { %v3133_v22 = vpop.f32.mrb[10].mxu1 }
 0xa24   : > { %v1413_v23 = vadd.f32 %v3133_v22, %v2896_v14  ;;  %v1407_v24 = vpop.f32.mrb[11].mxu1 }
 0xa25   : > { %v1408_v25 = vadd.f32 %v2896_v14, %v1407_v24 }
 0xa26   : > { %v1419_v26 = vmul.f32 0.70710677, %v1413_v23  ;;  %v1417_v19 = vmul.f32 0.5, %v1413_v23  ;;  %v2905_v23 = vld [vmem:[#allocation11] ss:$0 sm:$0xff] }
 0xa27   : > { %v1418_v20 = vmul.f32 0.70710677, %v1408_v25  ;;  %v1416_v21 = vmul.f32 0.5, %v1408_v25 }
 0xa28   : > { %3522 = verf.f32 %v1419_v26 }
 0xa29   : > { %3524 = verf.f32 %v1418_v20 }
 0xa32   : > { %v3523_v27 = vpop.eup %3522 }
 0xa33   : > { %v3525_v18 = vpop.eup %3524  ;;  %v1423_v28 = vadd.f32 1.0, %v3523_v27 }
 0xa34   : > { %v1422_v29 = vadd.f32 1.0, %v3525_v18 }
 0xa35   : > { %v1425_v31 = vmul.f32 %v1423_v28, %v1417_v19 }
 0xa36   : > { %v1424_v30 = vmul.f32 %v1422_v29, %v1416_v21 }
 0xa38   : > { %3150 = vmatprep.mubr.msk.f32.mxu0 %vm1441_vm15, %v1424_v30 }
 0xa39   : > { %3151 = vmatmul.mubr.msk.f32.vlgmr.msra.gmra.mrb[4].mxu0 %vm1441_vm15, %v1425_v31 }
 0xa3a   : > { %3175 = vmatprep.mubr.msk.f32.mxu0 %vm685_vm1, %v4233_v8 }
 0xb0c   : > { %v3152_v33 = vpop.f32.mrb[4].mxu0 }
 0xb0d   : > { %v1520_v34 = vadd.f32 %v3152_v33, %v2899_v32  ;;  %v1514_v35 = vpop.f32.mrb[5].mxu0 }
 0xb0e   : > { %v1515_v36 = vadd.f32 %v2899_v32, %v1514_v35 }
 0xb0f   : > { %v1524_v37 = vadd.f32 %v3122_v5, %v1520_v34  ;;  %v2907_v5 = vld [vmem:[%s4722_s1 + $0x28] sm:$0xff] }
 0xb10   : > { %v1523_v38 = vadd.f32 %v1515_v36, %v1315_v56  ;;  %v2908_v56 = vld [vmem:[%s4722_s1 + $0x30] sm:$0xff]  ;;  %v3318_v57 = vpack.c.bf16 %v2907_v5, %v2906_v55  ;;  %v2911_v36 = vld [vmem:[%s4723_s7 + $0x1] ss:$0 sm:$0xff] }
 0xb11   : > { %v3322_v59 = vpack.c.bf16 %v2909_v58, %v2908_v56 }
 0xb12   : > { %v3314_v39 = vpack.c.bf16 %v1524_v37, %v1523_v38 }
 0xb14   : > { %3315 = vmatprep.subr.bf16.mxu1 %v3314_v39 }
 0xb15   : > { %3317 = vmatpush3.bf16.msra.mxu1 %v3314_v39 }
 0xb16   : > { %3319 = vmatprep.subr.bf16.mxu1 %v3318_v57 }
 0xb18   : > { %3158 = vmatmul.mubr.msk.f32.vlgmr.msra.gmra.mrb[12].mxu1 %vm685_vm1, %v4390_v54 }
 0xb19   : > { %3321 = vmatpush3.bf16.msra.mxu1 %v3318_v57 }
 0xb1a   : > { %3323 = vmatprep.subr.bf16.mxu1 %v3322_v59 }
 0xb1d   : > { %3325 = vmatpush3.bf16.msra.mxu1 %v3322_v59 }
 0xbeb   : > { %v3159_v40 = vpop.f32.mrb[12].mxu1 }
 0xbec   : > { %v1591_v42 = vpop.f32.mrb[13].mxu1  ;;  %v1603_v43 = vsel %vm603_vm0, %v3159_v40, 0.0 }
 0xbed   : > { %1604 = vadd.xlane.f32.xlu0 %v1603_v43  ;;  %v1600_v44 = vsel %vm603_vm0, %v1591_v42, 0.0 }
 0xbee   : > { %1601 = vadd.xlane.f32.xlu1 %v1600_v44 }
 0xc7a   : > { %v1605_v45 = vpop.xlane.xlu0 %1604 }
 0xc7b   : > { %v1608_v46 = vmul.f32 0.03125, %v1605_v45  ;;  %v1602_v47 = vpop.xlane.xlu1 %1601 }
 0xc7c   : > { %v1607_v48 = vmul.f32 0.03125, %v1602_v47 }
 0xc7d   : > { %v1610_v49 = vsub.f32 %v3159_v40, %v1608_v46 }
 0xc7e   : > { %v1609_v50 = vsub.f32 %v1591_v42, %v1607_v48 }
 0xc7f   : > { %v1612_v51 = vmul.f32 %v1610_v49, %v1610_v49 }
 0xc80   : > { %v1611_v52 = vmul.f32 %v1609_v50, %v1609_v50 }
 0xc81   : > { %v1616_v53 = vsel %vm603_vm0, %v1612_v51, 0.0 }
 0xc82   : > { %1617 = vadd.xlane.f32.xlu0 %v1616_v53  ;;  %v1613_v7 = vsel %vm603_vm0, %v1611_v52, 0.0 }
 0xc83   : > { %1614 = vadd.xlane.f32.xlu1 %v1613_v7 }
 0xd0f   : > { %v1618_v61 = vpop.xlane.xlu0 %1617 }
 0xd10   : > { %v1620_v62 = vmul.f32 0.03125, %v1618_v61  ;;  %v1615_v1 = vpop.xlane.xlu1 %1614 }
 0xd11   : > { %v1619_v2 = vmul.f32 0.03125, %v1615_v1 }
 0xd12   : > { %v1622_v3 = vadd.f32 1e-05, %v1620_v62 }
 0xd13   : > { %v1621_v10 = vadd.f32 1e-05, %v1619_v2 }
 0xd14   : > { %3526 = vrsqrt.f32 %v1622_v3 }
 0xd15   : > { %3528 = vrsqrt.f32 %v1621_v10 }
 0xd1e   : > { %v3527_v11 = vpop.eup %3526 }
 0xd1f   : > { %v3529_v13 = vpop.eup %3528  ;;  %v1626_v14 = vmul.f32 %v3527_v11, %v1610_v49 }
 0xd20   : > { %v1625_v22 = vmul.f32 %v3529_v13, %v1609_v50 }
 0xd21   : > { %v1635_v24 = vmul.f32 %v2904_v12, %v1626_v14 }
 0xd22   : > { %v1634_v25 = vmul.f32 %v2904_v12, %v1625_v22 }
 0xd23   : > { %v1644_v26 = vadd.f32 %v2905_v23, %v1635_v24 }
 0xd24   : > { %v1643_v20 = vadd.f32 %v2905_v23, %v1634_v25 }
 0xd25   : > { %v1646_v27 = vsel %vm603_vm0, %v1644_v26, 0.0 }
 0xd26   : > { %v1645_v18 = vsel %vm603_vm0, %v1643_v20, 0.0 }
 0xd27   : > { %v1647_v28 = vadd.f32 %v1646_v27, %v1645_v18 }
 0xd29   : > { %v1648_v21 = vrot.slane %v1647_v28, 4 }
 0xd2b   : > { %v1649_v29 = vadd.f32 %v1648_v21, %v1647_v28 }
 0xd2d   : > { %v1650_v19 = vrot.slane %v1649_v29, 2 }
 0xd2f   : > { %v1651_v30 = vadd.f32 %v1650_v19, %v1649_v29 }
 0xd31   : > { %v1652_v31 = vrot.slane %v1651_v30, 1 }
 0xd33   : > { %v1653_v32 = vadd.f32 %v1652_v31, %v1651_v30 }
 0xd35   : > { %v1655_v33 = vmul.f32 0.0625, %v1653_v32 }
 0xd37   : > { %v4446_v34 = vsub.f32 %v1643_v20, %v1655_v33  ;;  %v4448_v35 = vsub.f32 %v1644_v26, %v1655_v33 }
 0xd39   : > { %3168 = vmatprep.mubr.msk.f32.mxu1 %vm603_vm0, %v4446_v34 }
 0xd3a   : > { %3169 = vmatmul.mubr.msk.f32.vlgmr.msra.gmra.mrb[14].mxu1 %vm603_vm0, %v4448_v35 }
 0xd3b   : > { %3182 = vmatprep.mubr.msk.f32.mxu1 %vm685_vm1, %v4248_v16 }
 0xe0d   : > { %v3170_v37 = vpop.f32.mrb[14].mxu1 }
 0xe0e   : > { %v1749_v38 = vadd.f32 %v3170_v37, %v2911_v36  ;;  %v1743_v39 = vpop.f32.mrb[15].mxu1 }
 0xe0f   : > { %v1744_v40 = vadd.f32 %v2911_v36, %v1743_v39 }
 0xe11   : > { %v3326_v42 = vpack.c.bf16 %v1749_v38, %v1744_v40 }
 0xe13   : > { %3327 = vmatprep.subr.bf16.mxu0 %v3326_v42  ;;  %3331 = vmatprep.subr.bf16.mxu1 %v3326_v42 }
 0xe14   : > { %3329 = vmatpush3.bf16.msra.mxu0 %v3326_v42  ;;  %3333 = vmatpush3.bf16.msra.mxu1 %v3326_v42 }
 0xe17   : > { %3176 = vmatmul.mubr.msk.f32.vlgmr.msra.gmra.mrb[6].mxu0 %vm685_vm1, %v4243_v15  ;;  %3183 = vmatmul.mubr.msk.f32.vlgmr.msra.gmra.mrb[16].mxu1 %vm685_vm1, %v4257_v17 }
 0xe18   : > { %3189 = vmatprep.mubr.msk.f32.mxu0 %vm685_vm1, %v4233_v8  ;;  %3196 = vmatprep.mubr.msk.f32.mxu1 %vm685_vm1, %v4248_v16 }
 0xeea   : > { %v4467_v43 = vpop.f32.mrb[6].mxu0  ;;  %v4469_v44 = vpop.f32.mrb[16].mxu1 }
 0xeeb   : > { %1906 = vrot.lane.b32.xlu0 %v4467_v43, %s4728_s21  ;;  %v4473_v45 = vpop.f32.mrb[7].mxu0  ;;  %v4475_v46 = vpop.f32.mrb[17].mxu1 }
 0xeec   : > { %1904 = vrot.lane.b32.xlu1 %v4473_v45, %s4728_s21 }
 0xef0   : > { %1914 = vrot.lane.b32.xlu1 %v4475_v46, %s4728_s21 }
 0xef4   : > { %1916 = vrot.lane.b32.xlu1 %v4469_v44, %s4728_s21  ;;  %s4731_s21 = sld [smem:[#allocation28_spill]] }
 0xf5d   : > { %v1907_v49 = vpop.permute.xlu0 %1906 }
 0xf5e   : > { %v1905_v47 = vpop.permute.xlu1 %1904  ;;  %v1911_v5 = vmul.f32 %v4467_v43, %v1907_v49  ;;  %v1935_v57 = vmul.f32 %v4469_v44, %v1907_v49 }
 0xf5f   : > { %v1910_v50 = vmul.f32 %v1905_v47, %v4473_v45  ;;  %v1934_v51 = vmul.f32 %v1905_v47, %v4475_v46 }
 0xf62   : > { %v1915_v48 = vpop.permute.xlu1 %1914 }
 0xf63   : > { %v1920_v52 = vmul.f32 %v1915_v48, %v4475_v46  ;;  %v1932_v53 = vmul.f32 %v1915_v48, %v4473_v45 }
 0xf65   : > { %v1922_v7 = vadd.f32 %v1920_v52, %v1910_v50  ;;  %v1936_v55 = vsub.f32 %v1932_v53, %v1934_v51 }
 0xf66   : > { %v1917_v56 = vpop.permute.xlu1 %1916 }
 0xf67   : > { %v1921_v58 = vmul.f32 %v4469_v44, %v1917_v56  ;;  %v1933_v59 = vmul.f32 %v4467_v43, %v1917_v56  ;;  %v1924_v61 = vsel %vm603_vm0, %v1922_v7, 0.0  ;;  %v1938_v2 = vsel %vm603_vm0, %v1936_v55, 0.0 }
 0xf68   : > { %1925 = vadd.xlane.f32.xlu0 %v1924_v61 }
 0xf69   : > { %v1923_v62 = vadd.f32 %v1921_v58, %v1911_v5  ;;  %v1937_v1 = vsub.f32 %v1933_v59, %v1935_v57 }
 0xf6b   : > { %v1927_v3 = vsel %vm603_vm0, %v1923_v62, 0.0  ;;  %v1941_v10 = vsel %vm603_vm0, %v1937_v1, 0.0 }
 0xf6c   : > { %1939 = vadd.xlane.f32.xlu0 %v1938_v2  ;;  %1928 = vadd.xlane.f32.xlu1 %v1927_v3 }
 0xf70   : > { %1942 = vadd.xlane.f32.xlu0 %v1941_v10 }
 0xff5   : > { %v1926_v11 = vpop.xlane.xlu0 %1925 }
 0xff6   : > { %v1930_v14 = vmul.f32 0.001953125, %v1926_v11 }
 0xff8   : > { %v1946_v26 = vmul.f32 %v1930_v14, %v4233_v8 }
 0xff9   : > { %v1940_v12 = vpop.xlane.xlu0 %1939  ;;  %v1929_v13 = vpop.xlane.xlu1 %1928 }
 0xffa   : > { %v1944_v22 = vmul.f32 0.001953125, %v1940_v12  ;;  %v1931_v24 = vmul.f32 0.001953125, %v1929_v13 }
 0xffc   : > { %v1948_v23 = vmul.f32 %v1944_v22, %v4248_v16  ;;  %v1947_v18 = vmul.f32 %v1931_v24, %v4243_v15 }
 0xffd   : > { %v1943_v25 = vpop.xlane.xlu0 %1942 }
 0xffe   : > { %v1945_v20 = vmul.f32 0.001953125, %v1943_v25  ;;  %v1950_v27 = vsub.f32 %v1946_v26, %v1948_v23 }
0x1000   : > { %v1949_v28 = vmul.f32 %v1945_v20, %v4257_v17  ;;  %v1952_v29 = vsel %vm685_vm1, %v1950_v27, 0.0 }
0x1002   : > { %v1951_v21 = vsub.f32 %v1947_v18, %v1949_v28 }
0x1004   : > { %v1953_v19 = vsel %vm685_vm1, %v1951_v21, 0.0 }
0x1005   : > { %v1954_v30 = vadd.f32 %v1953_v19, %v1952_v29 }
0x1007   : > { %v1955_v31 = vrot.slane %v1954_v30, 4 }
0x1009   : > { %v1956_v32 = vadd.f32 %v1955_v31, %v1954_v30 }
0x100b   : > { %v1957_v33 = vrot.slane %v1956_v32, 2 }
0x100d   : > { %v1958_v36 = vadd.f32 %v1957_v33, %v1956_v32 }
0x100f   : > { %v1959_v37 = vrot.slane %v1958_v36, 1 }
0x1011   : > { %v1960_v38 = vadd.f32 %v1959_v37, %v1958_v36 }
0x1013   : > { %v1962_v39 = vmul.f32 %v4309_v6, %v1960_v38  ;;  %v1961_v40 = vmul.f32 %v4312_v9, %v1960_v38 }
0x1015   : > { %v1966_v42 = vsel %vm685_vm1, %v1962_v39, 0.0  ;;  %v1963_v47 = vsel %vm685_vm1, %v1961_v40, 0.0 }
0x1016   : > { %1967 = vadd.xlane.f32.xlu0 %v1966_v42  ;;  %1964 = vadd.xlane.f32.xlu1 %v1963_v47 }
0x10a3   : > { %v1968_v48 = vpop.xlane.xlu0 %1967  ;;  %v1965_v49 = vpop.xlane.xlu1 %1964 }
0x10a4   : > { %vm1970_vm2 = vcmp.gt.f32.partialorder %v1968_v48, %v1960_v38  ;;  %vm1972_vm3 = vcmp.eq.f32.partialorder %v1968_v48, %v1960_v38  ;;  %vm1971_vm5 = vcmp.eq.f32.partialorder %v1965_v49, %v1960_v38  ;;  %vm1969_vm8 = vcmp.gt.f32.partialorder %v1965_v49, %v1960_v38 }
0x10a5   : > { %vm1974_vm6 = vmand %vm1972_vm3, %vm920_vm4 }
0x10a6   : > { %vm1976_vm9 = vmor %vm1970_vm2, %vm1974_vm6 }
0x10a7   : > { %v2919_v6 = vsel %vm1976_vm9, 1.0, %v3832_v4  ;;  %vm1973_vm10 = vmand %vm1971_vm5, %vm919_vm7 }
0x10a8   : > { %v1982_v9 = vsel %vm685_vm1, %v2919_v6, 0.0  ;;  %vm1975_vm11 = vmor %vm1969_vm8, %vm1973_vm10 }
0x10a9   : > { %v2918_v50 = vsel %vm1975_vm11, 1.0, %v3832_v4 }
0x10aa   : > { %v1981_v51 = vsel %vm685_vm1, %v2918_v50, 0.0  ;;  %v2926_v50 = vld [vmem:[%s4725_s3 + $0x30] sm:$0xff] }
0x10ab   : > { %v1983_v52 = vadd.f32 %v1982_v9, %v1981_v51  ;;  %v2927_v51 = vld [vmem:[%s4725_s3 + $0x38] sm:$0xff] }
0x10ad   : > { %v1984_v53 = vrot.slane %v1983_v52, 4 }
0x10af   : > { %v1985_v7 = vadd.f32 %v1984_v53, %v1983_v52  ;;  %v3346_v52 = vpack.c.bf16 %v2927_v51, %v2926_v50 }
0x10b1   : > { %v1986_v63 = vrot.slane %v1985_v7, 2 }
0x10b3   : > { %v1987_v55 = vadd.f32 %v1986_v63, %v1985_v7 }
0x10b5   : > { %v1988_v5 = vrot.slane %v1987_v55, 1 }
0x10b7   : > { %v1989_v56 = vadd.f32 %v1988_v5, %v1987_v55  ;;  %v2928_v5 = vld [vmem:[#allocation5 + $0x1] ss:$0 sm:$0xff] }
0x10b9   : > { %vm1990_vm4 = vcmp.lt.f32.partialorder %v1989_v56, 2.0 }
0x10ba   : > { %v1991_v57 = vsel %vm1990_vm4, %v1960_v38, -inf }
0x10bb   : > { %v1992_v58 = vsel %vm685_vm1, %v1991_v57, -inf }
0x10bc   : > { %1993 = vmax.xlane.f32.xlu1 %v1992_v58 }
0x1149   : > { %v1994_v60 = vpop.xlane.xlu1 %1993 }
0x114a   : > { %v1995_v0 = vsub.f32 %v1960_v38, %v1994_v60 }
0x114c   : > { %v1996_v59 = vmul.f32 1.442695, %v1995_v0 }
0x114e   : > { %3530 = vpow2.f32 %v1996_v59  ;;  %v2933_v59 = vld [vmem:[%s4726_s20 + $0x20] sm:$0xff] }
0x1158   : > { %v3531_v61 = vpop.eup %3530 }
0x1159   : > { %v1998_v4 = vsel %vm1990_vm4, %v3531_v61, 0.0  ;;  %v2934_v61 = vld [vmem:[%s4726_s20 + $0x28] sm:$0xff] }
0x115a   : > { %v1999_v62 = vsel %vm685_vm1, %v1998_v4, 0.0 }
0x115b   : > { %2000 = vadd.xlane.f32.xlu0 %v1999_v62 }
0x11e8   : > { %v2001_v1 = vpop.xlane.xlu0 %2000 }
0x11e9   : > { %3532 = vrcp.f32 %v2001_v1  ;;  %v3354_v1 = vpack.c.bf16 %v2934_v61, %v2933_v59 }
0x11f3   : > { %v3533_v2 = vpop.eup %3532 }
0x11f4   : > { %v2003_v3 = vmul.f32 %v3533_v2, %v1998_v4  ;;  %v2935_v2 = vld [vmem:[%s4726_s20 + $0x30] sm:$0xff] }
0x11f6   : > { %v2004_v10 = vmul.f32 0.0625, %v2003_v3 }
0x11f8   : > { %v2006_v11 = vmul.f32 %v2004_v10, %v4243_v15  ;;  %v2005_v12 = vmul.f32 %v2004_v10, %v4233_v8  ;;  %v2014_v22 = vmul.f32 %v2004_v10, %v4257_v17  ;;  %v2013_v23 = vmul.f32 %v2004_v10, %v4248_v16 }
0x11fa   : > { %v2010_v13 = vsel %vm685_vm1, %v2006_v11, 0.0  ;;  %v2007_v14 = vsel %vm685_vm1, %v2005_v12, 0.0  ;;  %v2018_v24 = vsel %vm685_vm1, %v2014_v22, 0.0  ;;  %v2015_v25 = vsel %vm685_vm1, %v2013_v23, 0.0  ;;  %v2940_v11 = vld [vmem:[%s4727_s28 + $0x40] sm:$0xff]  ;;  %v2941_v12 = vld [vmem:[%s4727_s28 + $0x48] sm:$0xff] }
0x11fb   : > { %2011 = vadd.xlane.f32.xlu0 %v2010_v13  ;;  %2008 = vadd.xlane.f32.xlu1 %v2007_v14  ;;  %v3362_v13 = vpack.c.bf16 %v2941_v12, %v2940_v11  ;;  %v2942_v14 = vld [vmem:[%s4727_s28 + $0x50] sm:$0xff]  ;;  %v2943_v22 = vld [vmem:[%s4727_s28 + $0x58] sm:$0xff]  ;;  %v2944_v23 = vld [vmem:[%s4727_s28 + $0x60] sm:$0xff] }
0x11ff   : > { %2019 = vadd.xlane.f32.xlu0 %v2018_v24  ;;  %2016 = vadd.xlane.f32.xlu1 %v2015_v25  ;;  %v2945_v24 = vld [vmem:[%s4727_s28 + $0x68] sm:$0xff] }
0x1200   : > { %v3370_v25 = vpack.c.bf16 %v2945_v24, %v2944_v23 }
0x1288   : > { %v2012_v26 = vpop.xlane.xlu0 %2011  ;;  %v2009_v20 = vpop.xlane.xlu1 %2008 }
0x1289   : > { %v2022_v8 = vmul.f32 %v4467_v43, %v2012_v26  ;;  %v2030_v27 = vmul.f32 %v4469_v44, %v2012_v26  ;;  %v2021_v18 = vmul.f32 %v2009_v20, %v4473_v45  ;;  %v2029_v28 = vmul.f32 %v2009_v20, %v4475_v46  ;;  %v2946_v26 = vld [vmem:[%s4727_s28 + $0x70] sm:$0xff]  ;;  %v2947_v20 = vld [vmem:[%s4727_s28 + $0x78] sm:$0xff] }
0x128c   : > { %v2020_v21 = vpop.xlane.xlu0 %2019  ;;  %v2017_v16 = vpop.xlane.xlu1 %2016 }
0x128d   : > { %v2024_v29 = vmul.f32 %v4469_v44, %v2020_v21  ;;  %v2028_v19 = vmul.f32 %v4467_v43, %v2020_v21  ;;  %v2023_v30 = vmul.f32 %v2017_v16, %v4475_v46  ;;  %v2027_v31 = vmul.f32 %v2017_v16, %v4473_v45  ;;  %v2924_v43 = vld [vmem:[%s4725_s3 + $0x20] sm:$0xff]  ;;  %v2925_v44 = vld [vmem:[%s4725_s3 + $0x28] sm:$0xff] }
0x128e   : > { %v3342_v9 = vpack.c.bf16 %v2925_v44, %v2924_v43 }
0x128f   : > { %v2026_v32 = vadd.f32 %v2024_v29, %v2022_v8  ;;  %v2032_v33 = vsub.f32 %v2028_v19, %v2030_v27  ;;  %v2025_v36 = vadd.f32 %v2023_v30, %v2021_v18  ;;  %v2031_v37 = vsub.f32 %v2027_v31, %v2029_v28  ;;  %v2937_v27 = vld [vmem:[#allocation7 + $0x1] ss:$0 sm:$0xff] }
0x1290   : > { %v3374_v8 = vpack.c.bf16 %v2947_v20, %v2946_v26 }
0x1291   : > { %v3513_v38 = vpack.i.bf16 %v2032_v33, %v2031_v37  ;;  %v3508_v39 = vpack.i.bf16 %v2026_v32, %v2025_v36 }
0x1293   : > { %3514 = vrot.lane.b32.xlu0 %v3513_v38, %s4729_s2  ;;  %3509 = vrot.lane.b32.xlu1 %v3508_v39, %s4729_s2  ;;  %s4615_s2 = scalar_lea.hbm %s4731_s21, %s2961_s18  ;;  %s3744_s18 = sshll.u32 %s3834_s26, 4  ;;  %s3745_s18 = int_to_ptr.vmem [resolvable:$false] %s3744_s18 }
0x1294   : > { %s3746_s5 = scalar_lea.vmem %s3745_s18, 512  ;;  %p3747_p13 = scmp.lt.s32.totalorder %s4617_s22, %s3745_s18 }
0x1295   : > { %p3748_p0 = scmp.lt.s32.totalorder %s3746_s5, %s3740_s14 }
0x1297   : > { %p3749_p2 = por %p3748_p0, %p3747_p13 }
0x1299   : > { %p3750_p8 = pnand %p3749_p2, %p3743_p1 }
0x1305   : > { %v3515_v40 = vpop.permute.xlu0 %3514  ;;  %v3510_v42 = vpop.permute.xlu1 %3509 }
0x1306   : > { %v3517_v45 = vunpack.i.h.bf16 %v3515_v40  ;;  %v3516_v46 = vunpack.i.l.bf16 %v3515_v40  ;;  %v3512_v47 = vunpack.i.h.bf16 %v3510_v42  ;;  %v3511_v48 = vunpack.i.l.bf16 %v3510_v42  ;;  %v2948_v40 = vld [vmem:[#allocation8 + $0x1] ss:$0 sm:$0xff] }
0x1308   : > { %v3338_v49 = vpack.c.bf16 %v3517_v45, %v3516_v46  ;;  %v3334_v6 = vpack.c.bf16 %v3512_v47, %v3511_v48 }
0x130a   : > { %3335 = vmatprep.subr.bf16.mxu0 %v3334_v6  ;;  %3339 = vmatprep.subr.bf16.mxu1 %v3338_v49 }
0x130b   : > { %3337 = vmatpush3.bf16.msra.mxu0 %v3334_v6  ;;  %3341 = vmatpush3.bf16.msra.mxu1 %v3338_v49 }
0x130c   : > { %3343 = vmatprep.subr.bf16.mxu0 %v3342_v9 }
0x130e   : > { %3190 = vmatmul.mubr.msk.f32.vlgmr.msra.gmra.mrb[8].mxu0 %vm685_vm1, %v4243_v15  ;;  %3197 = vmatmul.mubr.msk.f32.vlgmr.msra.gmra.mrb[18].mxu1 %vm685_vm1, %v4257_v17 }
0x130f   : > { %3345 = vmatpush3.bf16.msra.mxu0 %v3342_v9  ;;  %3214 = vmatprep.mubr.msk.f32.mxu1 %vm685_vm1, %v4372_v41 }
0x1310   : > { %3347 = vmatprep.subr.bf16.mxu0 %v3346_v52 }
0x1313   : > { %3349 = vmatpush3.bf16.msra.mxu0 %v3346_v52 }
0x1314   : > { %3363 = vmatprep.subr.bf16.mxu0 %v3362_v13 }
0x13e1   : > { %v3191_v53 = vpop.f32.mrb[8].mxu0  ;;  %v3198_v15 = vpop.f32.mrb[18].mxu1 }
0x13e2   : > { %v2200_v7 = vsub.f32 %v3191_v53, %v3198_v15  ;;  %v2107_v63 = vpop.f32.mrb[9].mxu0  ;;  %v2190_v17 = vpop.f32.mrb[19].mxu1 }
0x13e3   : > { %v2199_v55 = vsub.f32 %v2107_v63, %v2190_v17 }
0x13e5   : > { %3207 = vmatprep.mubr.msk.f32.mxu0 %vm603_vm0, %v2199_v55 }
0x13e6   : > { %3208 = vmatmul.mubr.msk.f32.vlgmr.msra.gmra.mrb[10].mxu0 %vm603_vm0, %v2200_v7 }
0x13e7   : > { %3365 = vmatpush3.bf16.msra.mxu0 %v3362_v13 }
0x14b9   : > { %v3209_v56 = vpop.f32.mrb[10].mxu0 }
0x14ba   : > { %v2292_v57 = vadd.f32 %v3209_v56, %v2928_v5  ;;  %v2286_v58 = vpop.f32.mrb[11].mxu0 }
0x14bb   : > { %v2287_v60 = vadd.f32 %v2928_v5, %v2286_v58 }
0x14bc   : > { %v2296_v0 = vadd.f32 %v2292_v57, %v4448_v35  ;;  %v2936_v35 = vld [vmem:[%s4726_s20 + $0x38] sm:$0xff] }
0x14bd   : > { %v2295_v4 = vadd.f32 %v2287_v60, %v4446_v34  ;;  %v3358_v3 = vpack.c.bf16 %v2936_v35, %v2935_v2  ;;  %v2954_v2 = vld [vmem:[#allocation11 + $0x1] ss:$0 sm:$0xff] }
0x14bf   : > { %v3350_v62 = vpack.c.bf16 %v2296_v0, %v2295_v4  ;;  %v2953_v4 = vld [vmem:[#allocation10 + $0x1] ss:$0 sm:$0xff] }
0x14c1   : > { %3351 = vmatprep.subr.bf16.mxu1 %v3350_v62 }
0x14c2   : > { %3353 = vmatpush3.bf16.msra.mxu1 %v3350_v62 }
0x14c3   : > { %3355 = vmatprep.subr.bf16.mxu1 %v3354_v1 }
0x14c5   : > { %3215 = vmatmul.mubr.msk.f32.vlgmr.msra.gmra.mrb[20].mxu1 %vm685_vm1, %v4390_v54 }
0x14c6   : > { %3357 = vmatpush3.bf16.msra.mxu1 %v3354_v1 }
0x14c7   : > { %3359 = vmatprep.subr.bf16.mxu1 %v3358_v3 }
0x14ca   : > { %3361 = vmatpush3.bf16.msra.mxu1 %v3358_v3 }
0x1598   : > { %v3216_v34 = vpop.f32.mrb[20].mxu1 }
0x1599   : > { %v2363_v10 = vpop.f32.mrb[21].mxu1 }
0x159a   : > { %3225 = vmatprep.mubr.msk.f32.mxu1 %vm603_vm0, %v2363_v10 }
0x159b   : > { %3226 = vmatmul.mubr.msk.f32.vlgmr.msra.gmra.mrb[22].mxu1 %vm603_vm0, %v3216_v34 }
0x159c   : > { %3251 = vmatprep.mubr.msk.f32.mxu1 %vm685_vm1, %v4372_v41  ;;  %v3366_v41 = vpack.c.bf16 %v2943_v22, %v2942_v14 }
0x159e   : > { %3367 = vmatprep.subr.bf16.mxu0 %v3366_v41 }
0x159f   : > { %3369 = vmatpush3.bf16.msra.mxu0 %v3366_v41 }
0x15a0   : > { %3371 = vmatprep.subr.bf16.mxu0 %v3370_v25 }
0x15a3   : > { %3373 = vmatpush3.bf16.msra.mxu0 %v3370_v25 }
0x15a4   : > { %3375 = vmatprep.subr.bf16.mxu0 %v3374_v8 }
0x15a7   : > { %3377 = vmatpush3.bf16.msra.mxu0 %v3374_v8 }
0x166e   : > { %v3227_v18 = vpop.f32.mrb[22].mxu1 }
0x166f   : > { %v2463_v28 = vadd.f32 %v3227_v18, %v2937_v27  ;;  %v2457_v21 = vpop.f32.mrb[23].mxu1 }
0x1670   : > { %v2458_v16 = vadd.f32 %v2937_v27, %v2457_v21 }
0x1671   : > { %v2469_v29 = vmul.f32 0.70710677, %v2463_v28  ;;  %v2467_v37 = vmul.f32 0.5, %v2463_v28 }
0x1672   : > { %v2468_v19 = vmul.f32 0.70710677, %v2458_v16  ;;  %v2466_v33 = vmul.f32 0.5, %v2458_v16 }
0x1673   : > { %3534 = verf.f32 %v2469_v29 }
0x1674   : > { %3536 = verf.f32 %v2468_v19 }
0x167d   : > { %v3535_v30 = vpop.eup %3534 }
0x167e   : > { %v3537_v31 = vpop.eup %3536  ;;  %v2473_v32 = vadd.f32 1.0, %v3535_v30 }
0x167f   : > { %v2472_v36 = vadd.f32 1.0, %v3537_v31 }
0x1680   : > { %v2475_v39 = vmul.f32 %v2473_v32, %v2467_v37 }
0x1681   : > { %v2474_v38 = vmul.f32 %v2472_v36, %v2466_v33 }
0x1683   : > { %3244 = vmatprep.mubr.msk.f32.mxu0 %vm1441_vm15, %v2474_v38 }
0x1684   : > { %3245 = vmatmul.mubr.msk.f32.vlgmr.msra.gmra.mrb[12].mxu0 %vm1441_vm15, %v2475_v39 }
0x1757   : > { %v3246_v42 = vpop.f32.mrb[12].mxu0 }
0x1758   : > { %v2571_v43 = vadd.f32 %v3246_v42, %v2948_v40  ;;  %v2565_v44 = vpop.f32.mrb[13].mxu0 }
0x1759   : > { %v2566_v45 = vadd.f32 %v2948_v40, %v2565_v44 }
0x175a   : > { %v2575_v46 = vadd.f32 %v3216_v34, %v2571_v43 }
0x175b   : > { %v2574_v47 = vadd.f32 %v2566_v45, %v2363_v10 }
0x175d   : > { %v3378_v48 = vpack.c.bf16 %v2575_v46, %v2574_v47 }
0x175f   : > { %3379 = vmatprep.subr.bf16.mxu1 %v3378_v48 }
0x1760   : > { %3381 = vmatpush3.bf16.msra.mxu1 %v3378_v48 }
0x1763   : > { %3252 = vmatmul.mubr.msk.f32.vlgmr.msra.gmra.mrb[24].mxu1 %vm685_vm1, %v4390_v54 }
0x1836   : > { %v3253_v49 = vpop.f32.mrb[24].mxu1 }
0x1837   : > { %v2642_v6 = vpop.f32.mrb[25].mxu1  ;;  %v2654_v9 = vsel %vm603_vm0, %v3253_v49, 0.0 }
0x1838   : > { %2655 = vadd.xlane.f32.xlu0 %v2654_v9  ;;  %v2651_v50 = vsel %vm603_vm0, %v2642_v6, 0.0 }
0x1839   : > { %2652 = vadd.xlane.f32.xlu1 %v2651_v50 }
0x18c5   : > { %v2656_v51 = vpop.xlane.xlu0 %2655 }
0x18c6   : > { %v2658_v52 = vmul.f32 0.03125, %v2656_v51  ;;  %v2653_v53 = vpop.xlane.xlu1 %2652 }
0x18c7   : > { %v2657_v15 = vmul.f32 0.03125, %v2653_v53 }
0x18c8   : > { %v2660_v7 = vsub.f32 %v3253_v49, %v2658_v52 }
0x18c9   : > { %v2659_v63 = vsub.f32 %v2642_v6, %v2657_v15 }
0x18ca   : > { %v2662_v17 = vmul.f32 %v2660_v7, %v2660_v7 }
0x18cb   : > { %v2661_v55 = vmul.f32 %v2659_v63, %v2659_v63 }
0x18cc   : > { %v2666_v5 = vsel %vm603_vm0, %v2662_v17, 0.0 }
0x18cd   : > { %2667 = vadd.xlane.f32.xlu0 %v2666_v5  ;;  %v2663_v54 = vsel %vm603_vm0, %v2661_v55, 0.0 }
0x18ce   : > { %2664 = vadd.xlane.f32.xlu1 %v2663_v54 }
0x195a   : > { %v2668_v56 = vpop.xlane.xlu0 %2667 }
0x195b   : > { %v2670_v57 = vmul.f32 0.03125, %v2668_v56  ;;  %v2665_v58 = vpop.xlane.xlu1 %2664 }
0x195c   : > { %v2669_v60 = vmul.f32 0.03125, %v2665_v58 }
0x195d   : > { %v2672_v0 = vadd.f32 1e-05, %v2670_v57 }
0x195e   : > { %v2671_v59 = vadd.f32 1e-05, %v2669_v60 }
0x195f   : > { %3538 = vrsqrt.f32 %v2672_v0 }
0x1960   : > { %3540 = vrsqrt.f32 %v2671_v59 }
0x1969   : > { %v3539_v61 = vpop.eup %3538 }
0x196a   : > { %v3541_v62 = vpop.eup %3540  ;;  %v2676_v1 = vmul.f32 %v3539_v61, %v2660_v7 }
0x196b   : > { %v2675_v35 = vmul.f32 %v3541_v62, %v2659_v63 }
0x196c   : > { %v2686_v3 = vmul.f32 %v2953_v4, %v2676_v1 }
0x196d   : > { %v2685_v34 = vmul.f32 %v2953_v4, %v2675_v35 }
0x196e   : > { %v2696_v10 = vadd.f32 %v2954_v2, %v2686_v3 }
0x196f   : > { %v2695_v11 = vadd.f32 %v2954_v2, %v2685_v34 }
0x1970   : > { %v2698_v12 = vsel %vm603_vm0, %v2696_v10, 0.0 }
0x1971   : > { %v2697_v13 = vsel %vm603_vm0, %v2695_v11, 0.0 }
0x1972   : > { %v2699_v14 = vadd.f32 %v2698_v12, %v2697_v13 }
0x1974   : > { %v2700_v22 = vrot.slane %v2699_v14, 4 }
0x1976   : > { %v2701_v41 = vadd.f32 %v2700_v22, %v2699_v14 }
0x1978   : > { %v2702_v23 = vrot.slane %v2701_v41, 2 }
0x197a   : > { %v2703_v24 = vadd.f32 %v2702_v23, %v2701_v41 }
0x197c   : > { %v2704_v25 = vrot.slane %v2703_v24, 1 }
0x197e   : > { %v2705_v26 = vadd.f32 %v2704_v25, %v2703_v24 }
0x1980   : > { %v2706_v20 = vmul.f32 0.0625, %v2705_v26 }
0x1982   : > { %v2707_v8 = vsub.f32 %v2695_v11, %v2706_v20  ;;  %v2708_v27 = vsub.f32 %v2696_v10, %v2706_v20 }
0x1984   : > { %2709 = vst.msk [vmem:[%s572_s27] sm:$0xff] %vm603_vm0, %v2707_v8  ;;  %2710 = vst.msk [vmem:[%s572_s27 + $0x8] sm:$0xff] %vm603_vm0, %v2708_v27 }
0x1985   : > { %3753 = shalt.err (!%p3750_p8)
}
0x1986   : > { %s3754_s27 = scalar_lea.hbm %s4615_s2, 256  ;;  %s3758_s26 = scalar_lea.hbm %s4731_s21, 512 }
0x1987   : > { %p3755_p4 = scmp.ne.s32.totalorder %s4615_s2, %s3754_s27  ;;  %p3759_p3 = scmp.lt.u32.totalorder %s4615_s2, %s4731_s21 }
0x1988   : > { %p3760_p5 = scmp.lt.u32.totalorder %s3758_s26, %s3754_s27  ;;  %p3762_p6 = scmp.lt.u32.totalorder %s3754_s27, %s4615_s2 }
0x1989   : > { %p3756_p10 = pnand %p3755_p4, %p4732_p9 }
0x198a   : > { %p3761_p7 = por %p3760_p5, %p3759_p3 }
0x198b   : > { %p3757_p11 = pneg %p3756_p10 }
0x198c   : > { %p3763_p12 = por %p3762_p6, %p3761_p7 }
0x198e   : > { %p3764_p1 = pnand %p3763_p12, %p3757_p11 }
0x1990   : > { %3767 = shalt.err (!%p3764_p1)
}
0x1991   : > { %s3835_s14 = smov 128   ;;  %s3836_s5 = smov 8  }
0x1992   : > { %s4733_s3 = scalar_lea.sflag [#allocation4], %s4188_s13 }
0x1993   : > { %3408 = dma.vmem_to_hbm [thread:$0]  (%p4732_p9), %s4617_s22, 256, %s4615_s2, %s4733_s3, %s3835_s14, %s3835_s14, %s3836_s5  }
0x1994 PF: > { %s2740_s0 = sand.u32 1, %s3806_s29   ;;  %p4734_p13 = scmp.ne.s32.totalorder %s4711_s24, 0 }
0x1995   : > { %p4735_p0 = scmp.ge.s32.totalorder %s3818_s16, 2  ;;  %s2741_s1 = scalar_lea.sflag [#allocation4], %s2740_s0 }
0x1997   : > { %p3434_p2 = pnand %p4735_p0, %p4734_p13 }
0x1999   : > { %3801 = dma.done.wait (!%p3434_p2), %s2741_s1, 256  }
0x199a   : > { %3803 = vsyncadd (!%p3434_p2), %s2741_s1, 4294967040  ;;  %p30_p8 = scmp.ge.s32.totalorder %s4106_s25, 4   ;;  %s4736_s29 = smov %s3810_s30 }
0x199b   : > { %s4737_s30 = smov %s3814_s15  ;;  %s4738_s15 = smov %s4117_s23 }
0x199c   : > { %s4739_s16 = smov %s4106_s25  ;;  %32 = sbr.rel (!%p30_p8) target bundleno = 18 (0x12), region = 155 }
0x19a3   :  { %2746 = vsyncpa [#allocation3], 1 }
0x19a4   :  { %2748 = vsyncpa [#allocation3 + $0x1], 1 }
0x19a5   :  { %2749 = vsyncpa [#allocation6], 1 }
0x19a6   :  { %2750 = vsyncpa [#allocation9], 1 }
0x19a7   :  { %2751 = vsyncpa [#allocation12], 1 }
0x19a8   :  { %2752 = vsyncpa [#allocation4], 1 }
0x19a9   :  { %2754 = vsyncpa [#allocation4 + $0x1], 1 }

</bundles_post_ra>
